<compile_context>
chip_gen: v7x
topology: tpu7x:2x2x1
jax: 0.10.0
libtpu: 0.0.40
codegen_flags: <defaults>
</compile_context>

<pallas_src>
import functools

import jax
import jax.numpy as jnp
from jax.experimental import pallas as pl
from jax.experimental.pallas import tpu as pltpu

LEAKY_SLOPE = 0.01  # torch.nn.functional.leaky_relu default negative_slope
_TARGET_STEPS = 8   # aim for this many pipelined grid steps


def _leaky_relu(v):
    return jnp.where(v >= 0, v, LEAKY_SLOPE * v)


def _nalini(v):
    return v + jax.nn.relu((v - 1.0) / 2.0) + jax.nn.relu((-v - 1.0) / 2.0)


_ACTIVATIONS = {
    "leakyrelu": _leaky_relu,
    "relu": jax.nn.relu,
    "tanh": jnp.tanh,
    "htanh": lambda v: jnp.clip(v, -1.0, 1.0),
    "selu": jax.nn.selu,
    "nalini": _nalini,
}


def _make_ae_kernel(num_layers, nonlinearity):
    act = _ACTIVATIONS[nonlinearity]

    def kernel(x_ref, *refs):
        out_ref = refs[-1]
        # First layer: feed the input tile in its native dtype (f32 or bf16)
        # straight to the MXU -- W0 is pre-cast to match -- with f32 accumulation.
        h = jnp.dot(x_ref[...], refs[0][...],
                    preferred_element_type=jnp.float32) + refs[1][...]
        for li in range(1, num_layers):
            h = act(h)
            h = jnp.dot(h, refs[2 * li][...],
                        preferred_element_type=jnp.float32) + refs[2 * li + 1][...]
        out_ref[...] = h.astype(out_ref.dtype)

    return kernel


def make_params(key, input_dimension, hidden_dimension, model_layers=2,
                dtype=jnp.float32):
    """Parameter init mirroring the nn.Linear shapes in autoencoder.__init__.

    Returns a flat list [W0, b0, W1, b1, ...] with W stored as (in, out)
    (already transposed relative to torch's (out, in)) and b as (1, out).
    """
    dims = []
    for ii in range(model_layers):  # encoding layers
        fan_in = input_dimension // 2 ** ii
        fan_out = (input_dimension // 2 ** (ii + 1)
                   if ii < model_layers - 1 else hidden_dimension)
        dims.append((fan_in, fan_out))
    dims.append((hidden_dimension, input_dimension // 2 ** (model_layers - 1)))
    for ii in range(model_layers - 1):  # remaining decoding layers
        fan_in = input_dimension // 2 ** (model_layers - (ii + 1))
        fan_out = input_dimension // 2 ** (model_layers - (ii + 1) - 1)
        dims.append((fan_in, fan_out))

    params = []
    for (fan_in, fan_out) in dims:
        key, kw, kb = jax.random.split(key, 3)
        bound = 1.0 / jnp.sqrt(jnp.asarray(fan_in, jnp.float32))
        w = jax.random.uniform(kw, (fan_in, fan_out), dtype, -bound, bound)
        b = jax.random.uniform(kb, (1, fan_out), dtype, -bound, bound)
        params.extend([w, b])
    return params


def _round_up(n, m):
    return ((n + m - 1) // m) * m


def _lane_densify_params(params, g):
    """Block-diagonal (kron) expand weights / tile biases by g for lane density."""
    if g == 1:
        return list(params)
    out = []
    for w, b in zip(params[0::2], params[1::2]):
        eye = jnp.eye(g, dtype=w.dtype)
        out.append(jnp.kron(eye, w))       # (g*in, g*out), block diagonal
        out.append(jnp.tile(b, (1, g)))    # (1, g*out)
    return out


@functools.partial(jax.jit,
                   static_argnames=("batch_tile", "group_lanes", "nonlinearity"))
def autoencoder_forward(x, params, *, batch_tile=None, group_lanes=True,
                        nonlinearity="leakyrelu"):
    """x: (B, D) f32 or bf16; params: [W0,b0,...] with W as (in,out).

    batch_tile (grouped rows) defaults to 4096 (f32) / 8192 (bf16); the real
    tile is auto-sized so the grid has ~8 steps and never a single step when
    there is work for two tiles.
    """
    B, D = x.shape
    num_layers = len(params) // 2

    # --- lane densification: fold g rows into one row of width g*D (>=128) ---
    g = max(1, 128 // D) if group_lanes else 1
    gparams = _lane_densify_params(params, g)
    # Match W0 to x's dtype: for bf16 inputs the first (full-width) matmul then
    # runs natively on the MXU instead of paying a whole-tile VPU upcast.
    gparams[0] = gparams[0].astype(x.dtype)

    Dg_in = int(gparams[0].shape[0])     # g * D
    Dg_out = int(gparams[-2].shape[1])   # g * D (output dim == input dim)

    # --- pad ONLY to a multiple of g (<= g-1 rows); g-aligned batches copy nothing ---
    B_pad = _round_up(B, g)
    if B_pad != B:
        x = jnp.pad(x, ((0, B_pad - B), (0, 0)))
    Bg = B_pad // g
    xg = x.reshape(Bg, Dg_in)

    # --- tile sizing (grouped rows) ---
    itemsize = jnp.dtype(x.dtype).itemsize
    max_tile = int(batch_tile) if batch_tile is not None else (
        8192 if itemsize <= 2 else 4096)
    min_tile = min(1024, max_tile)
    tb = pl.cdiv(Bg, _TARGET_STEPS)
    tb = max(min_tile, min(tb, max_tile))
    if Bg > 32:
        # Never collapse to a single grid step when there's work for two tiles:
        # keeps both v7x TensorCores busy and enables DMA/compute overlap.
        tb = min(tb, pl.cdiv(Bg, 2))
    tb = min(_round_up(tb, 16), _round_up(Bg, 16))
    grid = (pl.cdiv(Bg, tb),)  # partial last block handled by Pallas masking;
    # rows are independent, so the garbage tail rows never reach the output.

    in_specs = [pl.BlockSpec((tb, Dg_in), lambda i: (i, 0))]
    for p in gparams:
        # Constant block index -> fetched once, resident across all grid steps.
        # TODO(synk): mark these pipeline_mode=pl.Buffered(1) once single-buffer
        # mode is universally supported; saves ~0.1 MiB of unused double buffers.
        in_specs.append(pl.BlockSpec(p.shape, lambda i: (0, 0)))
    out_specs = pl.BlockSpec((tb, Dg_out), lambda i: (i, 0))

    # Real (un-kron'd) FLOPs: the zero blocks of the expanded weights are not work.
    flops = 2 * B_pad * sum(int(w.shape[0]) * int(w.shape[1])
                            for w in params[0::2])
    weight_bytes = sum(int(p.size) * jnp.dtype(p.dtype).itemsize for p in gparams)
    bytes_accessed = B_pad * D * itemsize * 2 + weight_bytes

    # Scoped-VMEM budget: double-buffered x/out tiles + (conservatively) double-
    # buffered weights, with 2x slack.  Fits v5e (16 MiB default) and v7x (64 MiB).
    tile_bytes = tb * (Dg_in + Dg_out) * itemsize
    vmem_limit = int(min(max(2 * (2 * tile_bytes + 2 * weight_bytes), 16 * 2**20),
                         48 * 2**20))

    kernel = _make_ae_kernel(num_layers, nonlinearity)

    outg = pl.pallas_call(
        kernel,
        out_shape=jax.ShapeDtypeStruct((Bg, Dg_out), x.dtype),
        grid_spec=pl.GridSpec(grid=grid, in_specs=in_specs, out_specs=out_specs),
        compiler_params=pltpu.CompilerParams(
            dimension_semantics=("parallel",),
            vmem_limit_bytes=vmem_limit),
        cost_estimate=pl.CostEstimate(
            flops=flops, transcendentals=0, bytes_accessed=bytes_accessed),
    )(xg, *gparams)

    out = outg.reshape(B_pad, D)
    # Slice only when the batch wasn't g-aligned (copies at most the output once).
    return out[:B] if B_pad != B else out


def reference_forward(x, params, nonlinearity="leakyrelu"):
    """Pure-JAX reference of the same forward pass."""
    act = _ACTIVATIONS[nonlinearity]
    n = len(params) // 2
    h = x
    for li in range(n):
        h = h @ params[2 * li] + params[2 * li + 1]
        if li < n - 1:
            h = act(h)
    return h


if __name__ == "__main__":
    input_dimension = 32
    hidden_dimension = 8
    batch = 3001  # not a multiple of g=4: exercises the tiny pad + tail-slice path

    key = jax.random.PRNGKey(0)
    k_params, k_x = jax.random.split(key)
    params = make_params(k_params, input_dimension, hidden_dimension,
                         model_layers=2)
    x = jax.random.normal(k_x, (batch, input_dimension), jnp.float32)

    # f32 run with default (auto) tiling: 2 pipelined grid steps, partial last block.
    out = autoencoder_forward(x, params)
    out = jax.block_until_ready(out)

    ref = reference_forward(x, params)
    assert out.shape == (batch, input_dimension)
    assert jnp.allclose(out, ref, atol=1e-4, rtol=1e-4), "f32 mismatch vs reference"

    # bf16 I/O run: bf16 activations streamed through HBM, bf16 first matmul on
    # the MXU, f32 accumulation / intermediates inside the kernel.
    out_bf16 = autoencoder_forward(x.astype(jnp.bfloat16), params)
    out_bf16 = jax.block_until_ready(out_bf16)
    assert out_bf16.shape == (batch, input_dimension)
    assert float(jnp.max(jnp.abs(out_bf16.astype(jnp.float32) - ref))) < 0.25, \
        "bf16 I/O output diverged from f32 reference"

    print("KERNEL_OK")
</pallas_src>

<mosaic_0001>
module attributes {stable_mosaic.version = 11 : i64} {
  func.func @kernel(%arg0: i32, %arg1: memref<384x128xf32, #tpu.memory_space<vmem>>, %arg2: memref<128x64xf32, #tpu.memory_space<vmem>>, %arg3: memref<1x64xf32, #tpu.memory_space<vmem>>, %arg4: memref<64x32xf32, #tpu.memory_space<vmem>>, %arg5: memref<1x32xf32, #tpu.memory_space<vmem>>, %arg6: memref<32x64xf32, #tpu.memory_space<vmem>>, %arg7: memref<1x64xf32, #tpu.memory_space<vmem>>, %arg8: memref<64x128xf32, #tpu.memory_space<vmem>>, %arg9: memref<1x128xf32, #tpu.memory_space<vmem>>, %arg10: memref<384x128xf32, #tpu.memory_space<vmem>>) attributes {dimension_semantics = [#tpu.dimension_semantics<parallel>], iteration_bounds = array<i64: 2>, scalar_prefetch = 0 : i64, scratch_operands = 0 : i64, tpu.core_type = #tpu.core_type<tc>, window_params = [{transform_indices = @transform_0, window_bounds = array<i64: 384, 128>}, {pipeline_mode = #tpu.pipeline_mode<synchronous>, transform_indices = @transform_1, window_bounds = array<i64: 128, 64>}, {pipeline_mode = #tpu.pipeline_mode<synchronous>, transform_indices = @transform_2, window_bounds = array<i64: 1, 64>}, {pipeline_mode = #tpu.pipeline_mode<synchronous>, transform_indices = @transform_3, window_bounds = array<i64: 64, 32>}, {pipeline_mode = #tpu.pipeline_mode<synchronous>, transform_indices = @transform_4, window_bounds = array<i64: 1, 32>}, {pipeline_mode = #tpu.pipeline_mode<synchronous>, transform_indices = @transform_5, window_bounds = array<i64: 32, 64>}, {pipeline_mode = #tpu.pipeline_mode<synchronous>, transform_indices = @transform_6, window_bounds = array<i64: 1, 64>}, {pipeline_mode = #tpu.pipeline_mode<synchronous>, transform_indices = @transform_7, window_bounds = array<i64: 64, 128>}, {pipeline_mode = #tpu.pipeline_mode<synchronous>, transform_indices = @transform_8, window_bounds = array<i64: 1, 128>}, {transform_indices = @transform_9, window_bounds = array<i64: 384, 128>}]} {
    %c0 = arith.constant 0 : index
    %c0_0 = arith.constant 0 : index
    %0 = vector.load %arg1[%c0, %c0_0] : memref<384x128xf32, #tpu.memory_space<vmem>>, vector<384x128xf32>
    %c0_1 = arith.constant 0 : index
    %c0_2 = arith.constant 0 : index
    %1 = vector.load %arg2[%c0_1, %c0_2] : memref<128x64xf32, #tpu.memory_space<vmem>>, vector<128x64xf32>
    %cst = arith.constant dense<0.000000e+00> : vector<384x64xf32>
    %2 = tpu.matmul %0, %1, %cst {dimension_numbers = #tpu.dot_dimension_numbers<[1], [0], [0], [1], [0, 0, 1, 1], [], []>} : vector<384x128xf32>, vector<128x64xf32>, vector<384x64xf32> -> vector<384x64xf32>
    %c0_3 = arith.constant 0 : index
    %c0_4 = arith.constant 0 : index
    %3 = vector.load %arg3[%c0_3, %c0_4] : memref<1x64xf32, #tpu.memory_space<vmem>>, vector<1x64xf32>
    %4 = vector.broadcast %3 : vector<1x64xf32> to vector<384x64xf32>
    %5 = arith.addf %2, %4 : vector<384x64xf32>
    %cst_5 = arith.constant 0.000000e+00 : f32
    %6 = vector.broadcast %cst_5 : f32 to vector<384x64xf32>
    %7 = arith.cmpf oge, %5, %6 : vector<384x64xf32>
    %cst_6 = arith.constant 0.00999999977 : f32
    %8 = vector.broadcast %cst_6 : f32 to vector<384x64xf32>
    %9 = arith.mulf %8, %5 : vector<384x64xf32>
    %10 = arith.select %7, %5, %9 : vector<384x64xi1>, vector<384x64xf32>
    %c0_7 = arith.constant 0 : index
    %c0_8 = arith.constant 0 : index
    %11 = vector.load %arg4[%c0_7, %c0_8] : memref<64x32xf32, #tpu.memory_space<vmem>>, vector<64x32xf32>
    %cst_9 = arith.constant dense<0.000000e+00> : vector<384x32xf32>
    %12 = tpu.matmul %10, %11, %cst_9 {dimension_numbers = #tpu.dot_dimension_numbers<[1], [0], [0], [1], [0, 0, 1, 1], [], []>} : vector<384x64xf32>, vector<64x32xf32>, vector<384x32xf32> -> vector<384x32xf32>
    %c0_10 = arith.constant 0 : index
    %c0_11 = arith.constant 0 : index
    %13 = vector.load %arg5[%c0_10, %c0_11] : memref<1x32xf32, #tpu.memory_space<vmem>>, vector<1x32xf32>
    %14 = vector.broadcast %13 : vector<1x32xf32> to vector<384x32xf32>
    %15 = arith.addf %12, %14 : vector<384x32xf32>
    %cst_12 = arith.constant 0.000000e+00 : f32
    %16 = vector.broadcast %cst_12 : f32 to vector<384x32xf32>
    %17 = arith.cmpf oge, %15, %16 : vector<384x32xf32>
    %cst_13 = arith.constant 0.00999999977 : f32
    %18 = vector.broadcast %cst_13 : f32 to vector<384x32xf32>
    %19 = arith.mulf %18, %15 : vector<384x32xf32>
    %20 = arith.select %17, %15, %19 : vector<384x32xi1>, vector<384x32xf32>
    %c0_14 = arith.constant 0 : index
    %c0_15 = arith.constant 0 : index
    %21 = vector.load %arg6[%c0_14, %c0_15] : memref<32x64xf32, #tpu.memory_space<vmem>>, vector<32x64xf32>
    %cst_16 = arith.constant dense<0.000000e+00> : vector<384x64xf32>
    %22 = tpu.matmul %20, %21, %cst_16 {dimension_numbers = #tpu.dot_dimension_numbers<[1], [0], [0], [1], [0, 0, 1, 1], [], []>} : vector<384x32xf32>, vector<32x64xf32>, vector<384x64xf32> -> vector<384x64xf32>
    %c0_17 = arith.constant 0 : index
    %c0_18 = arith.constant 0 : index
    %23 = vector.load %arg7[%c0_17, %c0_18] : memref<1x64xf32, #tpu.memory_space<vmem>>, vector<1x64xf32>
    %24 = vector.broadcast %23 : vector<1x64xf32> to vector<384x64xf32>
    %25 = arith.addf %22, %24 : vector<384x64xf32>
    %cst_19 = arith.constant 0.000000e+00 : f32
    %26 = vector.broadcast %cst_19 : f32 to vector<384x64xf32>
    %27 = arith.cmpf oge, %25, %26 : vector<384x64xf32>
    %cst_20 = arith.constant 0.00999999977 : f32
    %28 = vector.broadcast %cst_20 : f32 to vector<384x64xf32>
    %29 = arith.mulf %28, %25 : vector<384x64xf32>
    %30 = arith.select %27, %25, %29 : vector<384x64xi1>, vector<384x64xf32>
    %c0_21 = arith.constant 0 : index
    %c0_22 = arith.constant 0 : index
    %31 = vector.load %arg8[%c0_21, %c0_22] : memref<64x128xf32, #tpu.memory_space<vmem>>, vector<64x128xf32>
    %cst_23 = arith.constant dense<0.000000e+00> : vector<384x128xf32>
    %32 = tpu.matmul %30, %31, %cst_23 {dimension_numbers = #tpu.dot_dimension_numbers<[1], [0], [0], [1], [0, 0, 1, 1], [], []>} : vector<384x64xf32>, vector<64x128xf32>, vector<384x128xf32> -> vector<384x128xf32>
    %c0_24 = arith.constant 0 : index
    %c0_25 = arith.constant 0 : index
    %33 = vector.load %arg9[%c0_24, %c0_25] : memref<1x128xf32, #tpu.memory_space<vmem>>, vector<1x128xf32>
    %34 = vector.broadcast %33 : vector<1x128xf32> to vector<384x128xf32>
    %35 = arith.addf %32, %34 : vector<384x128xf32>
    %c0_26 = arith.constant 0 : index
    %c0_27 = arith.constant 0 : index
    %36 = vector.load %arg10[%c0_26, %c0_27] : memref<384x128xf32, #tpu.memory_space<vmem>>, vector<384x128xf32>
    tpu.vector_store %arg10[%c0_26, %c0_27], %35 {strides = array<i32>} : memref<384x128xf32, #tpu.memory_space<vmem>>, vector<384x128xf32>,
    return
  }
  func.func @transform_0(%arg0: i32) -> (i32, i32) {
    %c0_i32 = arith.constant 0 : i32
    %c0_i32_0 = arith.constant 0 : i32
    return %arg0, %c0_i32 : i32, i32
  }
  func.func @transform_1(%arg0: i32) -> (i32, i32) {
    %c0_i32 = arith.constant 0 : i32
    %c0_i32_0 = arith.constant 0 : i32
    %c0_i32_1 = arith.constant 0 : i32
    return %c0_i32, %c0_i32_0 : i32, i32
  }
  func.func @transform_2(%arg0: i32) -> (i32, i32) {
    %c0_i32 = arith.constant 0 : i32
    %c0_i32_0 = arith.constant 0 : i32
    %c0_i32_1 = arith.constant 0 : i32
    return %c0_i32, %c0_i32_0 : i32, i32
  }
  func.func @transform_3(%arg0: i32) -> (i32, i32) {
    %c0_i32 = arith.constant 0 : i32
    %c0_i32_0 = arith.constant 0 : i32
    %c0_i32_1 = arith.constant 0 : i32
    return %c0_i32, %c0_i32_0 : i32, i32
  }
  func.func @transform_4(%arg0: i32) -> (i32, i32) {
    %c0_i32 = arith.constant 0 : i32
    %c0_i32_0 = arith.constant 0 : i32
    %c0_i32_1 = arith.constant 0 : i32
    return %c0_i32, %c0_i32_0 : i32, i32
  }
  func.func @transform_5(%arg0: i32) -> (i32, i32) {
    %c0_i32 = arith.constant 0 : i32
    %c0_i32_0 = arith.constant 0 : i32
    %c0_i32_1 = arith.constant 0 : i32
    return %c0_i32, %c0_i32_0 : i32, i32
  }
  func.func @transform_6(%arg0: i32) -> (i32, i32) {
    %c0_i32 = arith.constant 0 : i32
    %c0_i32_0 = arith.constant 0 : i32
    %c0_i32_1 = arith.constant 0 : i32
    return %c0_i32, %c0_i32_0 : i32, i32
  }
  func.func @transform_7(%arg0: i32) -> (i32, i32) {
    %c0_i32 = arith.constant 0 : i32
    %c0_i32_0 = arith.constant 0 : i32
    %c0_i32_1 = arith.constant 0 : i32
    return %c0_i32, %c0_i32_0 : i32, i32
  }
  func.func @transform_8(%arg0: i32) -> (i32, i32) {
    %c0_i32 = arith.constant 0 : i32
    %c0_i32_0 = arith.constant 0 : i32
    %c0_i32_1 = arith.constant 0 : i32
    return %c0_i32, %c0_i32_0 : i32, i32
  }
  func.func @transform_9(%arg0: i32) -> (i32, i32) {
    %c0_i32 = arith.constant 0 : i32
    %c0_i32_0 = arith.constant 0 : i32
    return %arg0, %c0_i32 : i32, i32
  }
}

</mosaic_0001>

<bundles_post_ra>
// kernel: autoencoder_forward.1
= control target key start
LH: loop header
LB: loop body
LE: loop exit
PB: predicated region body
PF: predicated region fallthrough
CT: control target
= control target key end

     0   :  { %s4071_s30 = smov 0   ;;  %s4073_s10 = smov 0   ;;  %s4848_s0 = inlined_call_operand.vmem [shape: f32[751,128], index: 0, kind: input, shape index: {}]   ;;  %s4849_s1 = inlined_call_operand.vmem [shape: f32[128,64], index: 1, kind: input, shape index: {}]   ;;  %s4850_s2 = inlined_call_operand.vmem [shape: f32[1,64], index: 2, kind: input, shape index: {}]   ;;  %s4851_s3 = inlined_call_operand.vmem [shape: f32[64,32], index: 3, kind: input, shape index: {}]   ;;  %s4852_s4 = inlined_call_operand.vmem [shape: f32[1,32], index: 4, kind: input, shape index: {}]   ;;  %s4853_s5 = inlined_call_operand.vmem [shape: f32[32,64], index: 5, kind: input, shape index: {}]   ;;  %s4854_s6 = inlined_call_operand.vmem [shape: f32[1,64], index: 6, kind: input, shape index: {}]   ;;  %s4855_s7 = inlined_call_operand.vmem [shape: f32[64,128], index: 7, kind: input, shape index: {}]   ;;  %s4856_s8 = inlined_call_operand.vmem [shape: f32[1,128], index: 8, kind: input, shape index: {}]   ;;  %s4857_s9 = inlined_call_operand.vmem [shape: f32[751,128], index: 9, kind: output, shape index: {}]  }
   0x1   :  { %s4075_s11 = smov 0  }
   0x2 LB: > { %s4084_s12 = sadd.s32 4294967295, %s3987_s11   ;;  %s4086_s13 = sadd.s32 1, %s3987_s11   ;;  %s3987_s11 = sphi %s4075_s11, %s4866_s11   ;;  %s3983_s10 = sphi %s4073_s10, %s4865_s10   ;;  %s3979_s30 = sphi %s4071_s30, %s4864_s30  }
   0x3   : > { %s217_s14 = ssub.s32 %s3987_s11, %s4086_s13  ;;  %s220_s15 = sadd.s32 1, %s3983_s10 }
   0x4   : > { %p218_p0 = scmp.eq.s32.totalorder %s217_s14, 0  ;;  %p230_p1 = scmp.ne.s32.totalorder %s3983_s10, %s3979_s30 }
   0x5   : > { %p231_p2 = scmp.eq.s32.totalorder %s4084_s12, 1  ;;  %p3008_p3 = scmp.ge.s32.totalorder %s3987_s11, 1 }
   0x6   : > { %s4094_s16 = scalar_select %p218_p0, %s3983_s10, %s220_s15  }
   0x7   : > { %p4096_p4 = por %p231_p2, %p230_p1  ;;  %p296_p5 = scmp.lt.s32.totalorder %s3987_s11, 3 }
   0x9   : > { %p297_p6 = pnand %p3008_p3, %p296_p5 }
   0xa   : > { %v402_v0 = vld [vmem:[%s4849_s1] sm:$0xff] (!%p297_p6)  ;;  %v403_v1 = vld [vmem:[%s4849_s1 + $0x8] sm:$0xff] (!%p297_p6)  ;;  %v404_v2 = vld [vmem:[%s4849_s1 + $0x10] sm:$0xff] (!%p297_p6)  ;;  %s4110_s24 = smul.u32 (!%p297_p6), 48, %s4084_s12  ;;  %vm889_vm2 = vcmask (!%p297_p6), 523264  }
   0xb   : > { %300 = sbr.rel (%p297_p6) target bundleno = 1086 (0x43e), region = 56  ;;  %v3759_v3 = vpack.c.bf16 (!%p297_p6), %v403_v1, %v402_v0  ;;  %v405_v4 = vld [vmem:[%s4849_s1 + $0x18] sm:$0xff] (!%p297_p6)  ;;  %v406_v6 = vld [vmem:[%s4849_s1 + $0x20] sm:$0xff] (!%p297_p6)  ;;  %v407_v7 = vld [vmem:[%s4849_s1 + $0x28] sm:$0xff] (!%p297_p6) }
   0xc   : > { %v3763_v5 = vpack.c.bf16 (!%p297_p6), %v405_v4, %v404_v2  ;;  %p340_p7 = scmp.lt.s32.totalorder (!%p297_p6), %s4110_s24, 93  ;;  %v3767_v8 = vpack.c.bf16 (!%p297_p6), %v407_v7, %v406_v6  ;;  %v408_v9 = vld [vmem:[%s4849_s1 + $0x30] sm:$0xff] (!%p297_p6)  ;;  %v874_v10 = vld [vmem:[%s4851_s3] sm:$0xff] (!%p297_p6)  ;;  %v875_v11 = vld [vmem:[%s4851_s3 + $0x8] sm:$0xff] (!%p297_p6) }
   0xd   : > { %3760 = vmatprep.subr.bf16.mxu0 (!%p297_p6), %v3759_v3  ;;  %v409_v12 = vld [vmem:[%s4849_s1 + $0x38] sm:$0xff] (!%p297_p6)  ;;  %v3791_v13 = vpack.c.bf16 (!%p297_p6), %v875_v11, %v874_v10  ;;  %v876_v14 = vld [vmem:[%s4851_s3 + $0x10] sm:$0xff] (!%p297_p6)  ;;  %v410_v19 = vld [vmem:[%s4849_s1 + $0x40] sm:$0xff] (!%p297_p6) }
   0xe   : > { %3762 = vmatpush3.bf16.msra.mxu0 (!%p297_p6), %v3759_v3  ;;  %v877_v15 = vld [vmem:[%s4851_s3 + $0x18] sm:$0xff] (!%p297_p6)  ;;  %v3771_v18 = vpack.c.bf16 (!%p297_p6), %v409_v12, %v408_v9  ;;  %v411_v20 = vld [vmem:[%s4849_s1 + $0x48] sm:$0xff] (!%p297_p6)  ;;  %v412_v22 = vld [vmem:[%s4849_s1 + $0x50] sm:$0xff] (!%p297_p6) }
   0xf   : > { %3764 = vmatprep.subr.bf16.mxu0 (!%p297_p6), %v3763_v5  ;;  %v3795_v16 = vpack.c.bf16 (!%p297_p6), %v877_v15, %v876_v14  ;;  %3792 = vmatprep.subr.bf16.mxu1 (!%p297_p6), %v3791_v13  ;;  %v3775_v21 = vpack.c.bf16 (!%p297_p6), %v411_v20, %v410_v19  ;;  %v413_v23 = vld [vmem:[%s4849_s1 + $0x58] sm:$0xff] (!%p297_p6)  ;;  %v414_v25 = vld [vmem:[%s4849_s1 + $0x60] sm:$0xff] (!%p297_p6)  ;;  %v415_v26 = vld [vmem:[%s4849_s1 + $0x68] sm:$0xff] (!%p297_p6) }
  0x10   : > { %3794 = vmatpush3.bf16.msra.mxu1 (!%p297_p6), %v3791_v13  ;;  %v3779_v24 = vpack.c.bf16 (!%p297_p6), %v413_v23, %v412_v22  ;;  %v3783_v27 = vpack.c.bf16 (!%p297_p6), %v415_v26, %v414_v25  ;;  %v416_v28 = vld [vmem:[%s4849_s1 + $0x70] sm:$0xff] (!%p297_p6)  ;;  %v417_v29 = vld [vmem:[%s4849_s1 + $0x78] sm:$0xff] (!%p297_p6)  ;;  %v878_v9 = vld [vmem:[%s4851_s3 + $0x20] sm:$0xff] (!%p297_p6) }
  0x11   : > { %3796 = vmatprep.subr.bf16.mxu1 (!%p297_p6), %v3795_v16  ;;  %v3787_v30 = vpack.c.bf16 (!%p297_p6), %v417_v29, %v416_v28  ;;  %v879_v10 = vld [vmem:[%s4851_s3 + $0x28] sm:$0xff] (!%p297_p6)  ;;  %v880_v14 = vld [vmem:[%s4851_s3 + $0x30] sm:$0xff] (!%p297_p6)  ;;  %v881_v15 = vld [vmem:[%s4851_s3 + $0x38] sm:$0xff] (!%p297_p6) }
  0x12   : > { %s341_s14 = scalar_select %p340_p7, %s4110_s24, 93  ;;  %3766 = vmatpush3.bf16.msra.mxu0 %v3763_v5  ;;  %v3799_v12 = vpack.c.bf16 %v879_v10, %v878_v9  ;;  %v1483_v20 = vld [vmem:[%s4853_s5] sm:$0xff]  ;;  %v1485_v29 = vld [vmem:[%s4853_s5 + $0x10] sm:$0xff] }
  0x13   : > { %3768 = vmatprep.subr.bf16.mxu0 %v3767_v8  ;;  %v4239_v23 = vld [vmem:[%s4850_s2] ss:$0 sm:$0xff]  ;;  %s3170_s23 = smul.u32 (%p4096_p4), 384, %s4084_s12 }
  0x14   : > { %s3009_s26 = sshll.u32 %s341_s14, 3  ;;  %3798 = vmatpush3.bf16.msra.mxu1 %v3795_v16  ;;  %s332_s14 = sand.u32 1, %s3979_s30  }
  0x15   : > { %s4144_s19 = scalar_lea.vmem %s4848_s0, %s3009_s26  ;;  %3800 = vmatprep.subr.bf16.mxu1 %v3799_v12  ;;  %s3839_s20 = smul.u32 384, %s332_s14 }
  0x16   : > { %v354_v17 = vld [vmem:[%s4144_s19] sm:$0xff]  ;;  %3770 = vmatpush3.bf16.msra.mxu0 %v3767_v8  ;;  %v355_v31 = vld [vmem:[%s4144_s19 + $0x8] sm:$0xff]  ;;  %v356_v32 = vld [vmem:[%s4144_s19 + $0x10] sm:$0xff]  ;;  %s2608_s30 = ssub.s32 (%p4096_p4), 94, %s4110_s24  ;;  %s4686_s27 = scalar_lea.vmem (%p4096_p4), %s4857_s9, %s3170_s23  }
  0x17   : > { %3431 = vmatprep.mubr.f32.mxu0 %v354_v17  ;;  %3772 = vmatprep.subr.bf16.mxu0 %v3771_v18  ;;  %v357_v33 = vld [vmem:[%s4144_s19 + $0x18] sm:$0xff]  ;;  %v358_v34 = vld [vmem:[%s4144_s19 + $0x20] sm:$0xff]  ;;  %v359_v35 = vld [vmem:[%s4144_s19 + $0x28] sm:$0xff]  ;;  %v3803_v17 = vpack.c.bf16 %v881_v15, %v880_v14  ;;  %p2609_p8 = scmp.lt.s32.totalorder (%p4096_p4), %s2608_s30, 48 }
  0x18   : > { %v360_v36 = vld [vmem:[%s4144_s19 + $0x30] sm:$0xff]  ;;  %v361_v37 = vld [vmem:[%s4144_s19 + $0x38] sm:$0xff]  ;;  %v362_v38 = vld [vmem:[%s4144_s19 + $0x40] sm:$0xff]  ;;  %3802 = vmatpush3.bf16.msra.mxu1 %v3799_v12 }
  0x19   : > { %v363_v39 = vld [vmem:[%s4144_s19 + $0x48] sm:$0xff]  ;;  %v364_v40 = vld [vmem:[%s4144_s19 + $0x50] sm:$0xff]  ;;  %v365_v41 = vld [vmem:[%s4144_s19 + $0x58] sm:$0xff]  ;;  %3804 = vmatprep.subr.bf16.mxu1 %v3803_v17 }
  0x1a   : > { %3774 = vmatpush3.bf16.msra.mxu0 %v3771_v18  ;;  %v366_v42 = vld [vmem:[%s4144_s19 + $0x60] sm:$0xff]  ;;  %v367_v43 = vld [vmem:[%s4144_s19 + $0x68] sm:$0xff]  ;;  %v368_v44 = vld [vmem:[%s4144_s19 + $0x70] sm:$0xff] }
  0x1b   : > { %3776 = vmatprep.subr.bf16.mxu0 %v3775_v21  ;;  %v369_v45 = vld [vmem:[%s4144_s19 + $0x78] sm:$0xff]  ;;  %v370_v46 = vld [vmem:[%s4144_s19 + $0x80] sm:$0xff]  ;;  %v371_v47 = vld [vmem:[%s4144_s19 + $0x88] sm:$0xff] }
  0x1c   : > { %v372_v48 = vld [vmem:[%s4144_s19 + $0x90] sm:$0xff]  ;;  %v373_v49 = vld [vmem:[%s4144_s19 + $0x98] sm:$0xff]  ;;  %v374_v50 = vld [vmem:[%s4144_s19 + $0xa0] sm:$0xff]  ;;  %3806 = vmatpush3.bf16.msra.mxu1 %v3803_v17 }
  0x1d   : > { %v375_v51 = vld [vmem:[%s4144_s19 + $0xa8] sm:$0xff]  ;;  %v376_v52 = vld [vmem:[%s4144_s19 + $0xb0] sm:$0xff]  ;;  %v377_v53 = vld [vmem:[%s4144_s19 + $0xb8] sm:$0xff] }
  0x1e   : > { %3778 = vmatpush3.bf16.msra.mxu0 %v3775_v21  ;;  %v378_v54 = vld [vmem:[%s4144_s19 + $0xc0] sm:$0xff]  ;;  %v379_v55 = vld [vmem:[%s4144_s19 + $0xc8] sm:$0xff]  ;;  %v380_v56 = vld [vmem:[%s4144_s19 + $0xd0] sm:$0xff] }
  0x1f   : > { %3780 = vmatprep.subr.bf16.mxu0 %v3779_v24  ;;  %v381_v57 = vld [vmem:[%s4144_s19 + $0xd8] sm:$0xff]  ;;  %v382_v58 = vld [vmem:[%s4144_s19 + $0xe0] sm:$0xff]  ;;  %v383_v59 = vld [vmem:[%s4144_s19 + $0xe8] sm:$0xff] }
  0x20   : > { %v384_v60 = vld [vmem:[%s4144_s19 + $0xf0] sm:$0xff]  ;;  %v385_v61 = vld [vmem:[%s4144_s19 + $0xf8] sm:$0xff]  ;;  %v386_v62 = vld [vmem:[%s4144_s19 + $0x100] sm:$0xff] }
  0x21   : > { %v387_v63 = vld [vmem:[%s4144_s19 + $0x108] sm:$0xff]  ;;  %v388_v0 = vld [vmem:[%s4144_s19 + $0x110] sm:$0xff]  ;;  %v389_v1 = vld [vmem:[%s4144_s19 + $0x118] sm:$0xff] }
  0x22   : > { %3782 = vmatpush3.bf16.msra.mxu0 %v3779_v24  ;;  %v390_v2 = vld [vmem:[%s4144_s19 + $0x120] sm:$0xff]  ;;  %v391_v3 = vld [vmem:[%s4144_s19 + $0x128] sm:$0xff]  ;;  %v392_v4 = vld [vmem:[%s4144_s19 + $0x130] sm:$0xff] }
  0x23   : > { %3784 = vmatprep.subr.bf16.mxu0 %v3783_v27  ;;  %v393_v5 = vld [vmem:[%s4144_s19 + $0x138] sm:$0xff]  ;;  %v394_v6 = vld [vmem:[%s4144_s19 + $0x140] sm:$0xff]  ;;  %v395_v7 = vld [vmem:[%s4144_s19 + $0x148] sm:$0xff] }
  0x24   : > { %v396_v8 = vld [vmem:[%s4144_s19 + $0x150] sm:$0xff]  ;;  %v397_v11 = vld [vmem:[%s4144_s19 + $0x158] sm:$0xff]  ;;  %v398_v13 = vld [vmem:[%s4144_s19 + $0x160] sm:$0xff] }
  0x25   : > { %v399_v16 = vld [vmem:[%s4144_s19 + $0x168] sm:$0xff]  ;;  %v400_v18 = vld [vmem:[%s4144_s19 + $0x170] sm:$0xff]  ;;  %v401_v19 = vld [vmem:[%s4144_s19 + $0x178] sm:$0xff]  ;;  %s4583_s19 = scalar_lea.vmem [#allocation2], %s3839_s20  }
  0x26   : > { %3786 = vmatpush3.bf16.msra.mxu0 %v3783_v27  ;;  %v1484_v21 = vld [vmem:[%s4853_s5 + $0x8] sm:$0xff] }
  0x27   : > { %3788 = vmatprep.subr.bf16.mxu0 %v3787_v30  ;;  %v3807_v22 = vpack.c.bf16 %v1484_v21, %v1483_v20 }
  0x29   : > { %3808 = vmatprep.subr.bf16.mxu1 %v3807_v22 }
  0x2a   : > { %3790 = vmatpush3.bf16.msra.mxu0 %v3787_v30  ;;  %v1486_v30 = vld [vmem:[%s4853_s5 + $0x18] sm:$0xff] }
  0x2d   : > { %3432 = vmatmul.mubr.f32.vlgmr.msra.gmra.mrb[0].mxu0 %v355_v31 }
  0x2e   : > { %3434 = vmatprep.mubr.f32.mxu0 %v356_v32 }
  0x31   : > { %3435 = vmatmul.mubr.f32.gmra.mrb[2].mxu0 %v357_v33 }
  0x32   : > { %3437 = vmatprep.mubr.f32.mxu0 %v358_v34 }
  0x35   : > { %3438 = vmatmul.mubr.f32.gmra.mrb[4].mxu0 %v359_v35 }
  0x36   : > { %3440 = vmatprep.mubr.f32.mxu0 %v360_v36 }
  0x39   : > { %3441 = vmatmul.mubr.f32.gmra.mrb[6].mxu0 %v361_v37  ;;  %v3811_v37 = vpack.c.bf16 %v1486_v30, %v1485_v29 }
  0x3a   : > { %3443 = vmatprep.mubr.f32.mxu0 %v362_v38 }
  0x3d   : > { %3444 = vmatmul.mubr.f32.gmra.mrb[8].mxu0 %v363_v39 }
  0x3e   : > { %3446 = vmatprep.mubr.f32.mxu0 %v364_v40 }
  0x41   : > { %3447 = vmatmul.mubr.f32.gmra.mrb[10].mxu0 %v365_v41 }
  0x42   : > { %3449 = vmatprep.mubr.f32.mxu0 %v366_v42 }
  0x45   : > { %3450 = vmatmul.mubr.f32.gmra.mrb[12].mxu0 %v367_v43 }
  0x46   : > { %3452 = vmatprep.mubr.f32.mxu0 %v368_v44 }
  0x49   : > { %3453 = vmatmul.mubr.f32.gmra.mrb[14].mxu0 %v369_v45 }
  0x4a   : > { %3455 = vmatprep.mubr.f32.mxu0 %v370_v46 }
  0x4d   : > { %3456 = vmatmul.mubr.f32.gmra.mrb[16].mxu0 %v371_v47 }
  0x4e   : > { %3458 = vmatprep.mubr.f32.mxu0 %v372_v48 }
  0x51   : > { %3459 = vmatmul.mubr.f32.gmra.mrb[18].mxu0 %v373_v49 }
  0x52   : > { %3461 = vmatprep.mubr.f32.mxu0 %v374_v50 }
  0x55   : > { %3462 = vmatmul.mubr.f32.gmra.mrb[20].mxu0 %v375_v51 }
  0x56   : > { %3464 = vmatprep.mubr.f32.mxu0 %v376_v52 }
  0x59   : > { %3465 = vmatmul.mubr.f32.gmra.mrb[22].mxu0 %v377_v53 }
  0x5a   : > { %3467 = vmatprep.mubr.f32.mxu0 %v378_v54 }
  0x5d   : > { %3468 = vmatmul.mubr.f32.gmra.mrb[24].mxu0 %v379_v55 }
  0x5e   : > { %3470 = vmatprep.mubr.f32.mxu0 %v380_v56 }
  0x61   : > { %3471 = vmatmul.mubr.f32.gmra.mrb[26].mxu0 %v381_v57 }
  0x62   : > { %3473 = vmatprep.mubr.f32.mxu0 %v382_v58 }
  0x65   : > { %3474 = vmatmul.mubr.f32.gmra.mrb[28].mxu0 %v383_v59 }
  0x66   : > { %3476 = vmatprep.mubr.f32.mxu0 %v384_v60 }
  0x69   : > { %3477 = vmatmul.mubr.f32.gmra.mrb[30].mxu0 %v385_v61 }
  0x6a   : > { %3479 = vmatprep.mubr.f32.mxu0 %v386_v62 }
  0x6d   : > { %3480 = vmatmul.mubr.f32.gmra.mrb[32].mxu0 %v387_v63 }
  0x6e   : > { %3482 = vmatprep.mubr.f32.mxu0 %v388_v0 }
  0x71   : > { %3483 = vmatmul.mubr.f32.gmra.mrb[34].mxu0 %v389_v1 }
  0x72   : > { %3485 = vmatprep.mubr.f32.mxu0 %v390_v2 }
  0x75   : > { %3486 = vmatmul.mubr.f32.gmra.mrb[36].mxu0 %v391_v3 }
  0x76   : > { %3488 = vmatprep.mubr.f32.mxu0 %v392_v4 }
  0x79   : > { %3489 = vmatmul.mubr.f32.gmra.mrb[38].mxu0 %v393_v5 }
  0x7a   : > { %3491 = vmatprep.mubr.f32.mxu0 %v394_v6 }
  0x7d   : > { %3492 = vmatmul.mubr.f32.gmra.mrb[40].mxu0 %v395_v7 }
  0x7e   : > { %3494 = vmatprep.mubr.f32.mxu0 %v396_v8 }
  0x81   : > { %3495 = vmatmul.mubr.f32.gmra.mrb[42].mxu0 %v397_v11 }
  0x82   : > { %3497 = vmatprep.mubr.f32.mxu0 %v398_v13 }
  0x85   : > { %3498 = vmatmul.mubr.f32.gmra.mrb[44].mxu0 %v399_v16 }
  0x86   : > { %3500 = vmatprep.mubr.f32.mxu0 %v400_v18 }
  0x89   : > { %3501 = vmatmul.mubr.f32.gmra.mrb[46].mxu0 %v401_v19 }
 0x100   : > { %v3433_v24 = vpop.f32.mrb[0].mxu0 }
 0x101   : > { %v497_v25 = vadd.f32 %v3433_v24, %v4239_v23  ;;  %v491_v26 = vpop.f32.mrb[1].mxu0 }
 0x102   : > { %v492_v27 = vadd.f32 %v4239_v23, %v491_v26 }
 0x103   : > { %v779_v28 = vmul.f32 0.01, %v497_v25  ;;  %vm731_vm0 = vcmp.ge.f32.partialorder %v497_v25, 0.0 }
 0x104   : > { %v3436_v31 = vpop.f32.mrb[2].mxu0  ;;  %vm730_vm1 = vcmp.ge.f32.partialorder %v492_v27, 0.0  ;;  %v778_v32 = vmul.f32 0.01, %v492_v27 }
 0x105   : > { %v507_v33 = vadd.f32 %v3436_v31, %v4239_v23  ;;  %v501_v34 = vpop.f32.mrb[3].mxu0  ;;  %v827_v39 = vsel %vm731_vm0, %v497_v25, %v779_v28 }
 0x106   : > { %v502_v35 = vadd.f32 %v4239_v23, %v501_v34  ;;  %v826_v36 = vsel %vm730_vm1, %v492_v27, %v778_v32 }
 0x107   : > { %v781_v38 = vmul.f32 0.01, %v507_v33  ;;  %3519 = vmatprep.mubr.msk.f32.mxu1 %vm889_vm2, %v826_v36  ;;  %vm733_vm3 = vcmp.ge.f32.partialorder %v507_v33, 0.0 }
 0x108   : > { %vm732_vm4 = vcmp.ge.f32.partialorder %v502_v35, 0.0  ;;  %v780_v40 = vmul.f32 0.01, %v502_v35  ;;  %v3439_v41 = vpop.f32.mrb[4].mxu0  ;;  %3520 = vmatmul.mubr.msk.f32.vlgmr.msra.gmra.mrb[0].mxu1 %vm889_vm2, %v827_v39 }
 0x109   : > { %v517_v42 = vadd.f32 %v3439_v41, %v4239_v23  ;;  %v511_v43 = vpop.f32.mrb[5].mxu0  ;;  %3810 = vmatpush3.bf16.msra.mxu1 %v3807_v22  ;;  %v829_v47 = vsel %vm733_vm3, %v507_v33, %v781_v38 }
 0x10a   : > { %v512_v44 = vadd.f32 %v4239_v23, %v511_v43  ;;  %v828_v45 = vsel %vm732_vm4, %v502_v35, %v780_v40  ;;  %3812 = vmatprep.subr.bf16.mxu1 %v3811_v37 }
 0x10b   : > { %v783_v46 = vmul.f32 0.01, %v517_v42  ;;  %3522 = vmatprep.mubr.msk.f32.mxu1 %vm889_vm2, %v828_v45  ;;  %vm735_vm5 = vcmp.ge.f32.partialorder %v517_v42, 0.0 }
 0x10c   : > { %vm734_vm6 = vcmp.ge.f32.partialorder %v512_v44, 0.0  ;;  %v782_v48 = vmul.f32 0.01, %v512_v44  ;;  %v3442_v49 = vpop.f32.mrb[6].mxu0  ;;  %3523 = vmatmul.mubr.msk.f32.gmra.mrb[2].mxu1 %vm889_vm2, %v829_v47 }
 0x10d   : > { %v527_v50 = vadd.f32 %v3442_v49, %v4239_v23  ;;  %v521_v51 = vpop.f32.mrb[7].mxu0  ;;  %3814 = vmatpush3.bf16.msra.mxu1 %v3811_v37  ;;  %v831_v55 = vsel %vm735_vm5, %v517_v42, %v783_v46 }
 0x10e   : > { %v522_v52 = vadd.f32 %v4239_v23, %v521_v51  ;;  %v830_v53 = vsel %vm734_vm6, %v512_v44, %v782_v48 }
 0x10f   : > { %v785_v54 = vmul.f32 0.01, %v527_v50  ;;  %3525 = vmatprep.mubr.msk.f32.mxu1 %vm889_vm2, %v830_v53  ;;  %vm737_vm7 = vcmp.ge.f32.partialorder %v527_v50, 0.0 }
 0x110   : > { %vm736_vm8 = vcmp.ge.f32.partialorder %v522_v52, 0.0  ;;  %v784_v56 = vmul.f32 0.01, %v522_v52  ;;  %v3445_v57 = vpop.f32.mrb[8].mxu0  ;;  %3526 = vmatmul.mubr.msk.f32.gmra.mrb[4].mxu1 %vm889_vm2, %v831_v55 }
 0x111   : > { %v537_v58 = vadd.f32 %v3445_v57, %v4239_v23  ;;  %v531_v59 = vpop.f32.mrb[9].mxu0  ;;  %v833_v63 = vsel %vm737_vm7, %v527_v50, %v785_v54 }
 0x112   : > { %v532_v60 = vadd.f32 %v4239_v23, %v531_v59  ;;  %v832_v61 = vsel %vm736_vm8, %v522_v52, %v784_v56 }
 0x113   : > { %v787_v62 = vmul.f32 0.01, %v537_v58  ;;  %3528 = vmatprep.mubr.msk.f32.mxu1 %vm889_vm2, %v832_v61  ;;  %vm739_vm9 = vcmp.ge.f32.partialorder %v537_v58, 0.0 }
 0x114   : > { %vm738_vm10 = vcmp.ge.f32.partialorder %v532_v60, 0.0  ;;  %v786_v0 = vmul.f32 0.01, %v532_v60  ;;  %v3448_v1 = vpop.f32.mrb[10].mxu0  ;;  %3529 = vmatmul.mubr.msk.f32.gmra.mrb[6].mxu1 %vm889_vm2, %v833_v63 }
 0x115   : > { %v547_v2 = vadd.f32 %v3448_v1, %v4239_v23  ;;  %v541_v3 = vpop.f32.mrb[11].mxu0  ;;  %v835_v7 = vsel %vm739_vm9, %v537_v58, %v787_v62 }
 0x116   : > { %v542_v4 = vadd.f32 %v4239_v23, %v541_v3  ;;  %v834_v5 = vsel %vm738_vm10, %v532_v60, %v786_v0 }
 0x117   : > { %v789_v6 = vmul.f32 0.01, %v547_v2  ;;  %3531 = vmatprep.mubr.msk.f32.mxu1 %vm889_vm2, %v834_v5  ;;  %vm741_vm11 = vcmp.ge.f32.partialorder %v547_v2, 0.0 }
 0x118   : > { %vm740_vm12 = vcmp.ge.f32.partialorder %v542_v4, 0.0  ;;  %v788_v8 = vmul.f32 0.01, %v542_v4  ;;  %v3451_v9 = vpop.f32.mrb[12].mxu0  ;;  %3532 = vmatmul.mubr.msk.f32.gmra.mrb[8].mxu1 %vm889_vm2, %v835_v7 }
 0x119   : > { %v557_v10 = vadd.f32 %v3451_v9, %v4239_v23  ;;  %v551_v11 = vpop.f32.mrb[13].mxu0  ;;  %v837_v15 = vsel %vm741_vm11, %v547_v2, %v789_v6 }
 0x11a   : > { %v552_v12 = vadd.f32 %v4239_v23, %v551_v11  ;;  %v836_v13 = vsel %vm740_vm12, %v542_v4, %v788_v8 }
 0x11b   : > { %v791_v14 = vmul.f32 0.01, %v557_v10  ;;  %3534 = vmatprep.mubr.msk.f32.mxu1 %vm889_vm2, %v836_v13  ;;  %vm743_vm13 = vcmp.ge.f32.partialorder %v557_v10, 0.0 }
 0x11c   : > { %vm742_vm14 = vcmp.ge.f32.partialorder %v552_v12, 0.0  ;;  %v790_v16 = vmul.f32 0.01, %v552_v12  ;;  %v3454_v17 = vpop.f32.mrb[14].mxu0  ;;  %3535 = vmatmul.mubr.msk.f32.gmra.mrb[10].mxu1 %vm889_vm2, %v837_v15 }
 0x11d   : > { %v567_v18 = vadd.f32 %v3454_v17, %v4239_v23  ;;  %v561_v19 = vpop.f32.mrb[15].mxu0  ;;  %v839_v24 = vsel %vm743_vm13, %v557_v10, %v791_v14 }
 0x11e   : > { %v562_v20 = vadd.f32 %v4239_v23, %v561_v19  ;;  %v838_v21 = vsel %vm742_vm14, %v552_v12, %v790_v16 }
 0x11f   : > { %v793_v22 = vmul.f32 0.01, %v567_v18  ;;  %3537 = vmatprep.mubr.msk.f32.mxu1 %vm889_vm2, %v838_v21  ;;  %vm745_vm15 = vcmp.ge.f32.partialorder %v567_v18, 0.0 }
 0x120   : > { %vm744_vm0 = vcmp.ge.f32.partialorder %v562_v20, 0.0  ;;  %v792_v25 = vmul.f32 0.01, %v562_v20  ;;  %v3457_v26 = vpop.f32.mrb[16].mxu0  ;;  %3538 = vmatmul.mubr.msk.f32.gmra.mrb[12].mxu1 %vm889_vm2, %v839_v24 }
 0x121   : > { %v577_v27 = vadd.f32 %v3457_v26, %v4239_v23  ;;  %v571_v28 = vpop.f32.mrb[17].mxu0  ;;  %v841_v32 = vsel %vm745_vm15, %v567_v18, %v793_v22 }
 0x122   : > { %v572_v29 = vadd.f32 %v4239_v23, %v571_v28  ;;  %v840_v30 = vsel %vm744_vm0, %v562_v20, %v792_v25 }
 0x123   : > { %v795_v31 = vmul.f32 0.01, %v577_v27  ;;  %3540 = vmatprep.mubr.msk.f32.mxu1 %vm889_vm2, %v840_v30  ;;  %vm747_vm1 = vcmp.ge.f32.partialorder %v577_v27, 0.0 }
 0x124   : > { %vm746_vm3 = vcmp.ge.f32.partialorder %v572_v29, 0.0  ;;  %v794_v33 = vmul.f32 0.01, %v572_v29  ;;  %v3460_v34 = vpop.f32.mrb[18].mxu0  ;;  %3541 = vmatmul.mubr.msk.f32.gmra.mrb[14].mxu1 %vm889_vm2, %v841_v32 }
 0x125   : > { %v587_v35 = vadd.f32 %v3460_v34, %v4239_v23  ;;  %v581_v36 = vpop.f32.mrb[19].mxu0  ;;  %v843_v40 = vsel %vm747_vm1, %v577_v27, %v795_v31 }
 0x126   : > { %v582_v37 = vadd.f32 %v4239_v23, %v581_v36  ;;  %v842_v38 = vsel %vm746_vm3, %v572_v29, %v794_v33 }
 0x127   : > { %v797_v39 = vmul.f32 0.01, %v587_v35  ;;  %3543 = vmatprep.mubr.msk.f32.mxu1 %vm889_vm2, %v842_v38  ;;  %vm749_vm4 = vcmp.ge.f32.partialorder %v587_v35, 0.0 }
 0x128   : > { %vm748_vm5 = vcmp.ge.f32.partialorder %v582_v37, 0.0  ;;  %v796_v41 = vmul.f32 0.01, %v582_v37  ;;  %v3463_v42 = vpop.f32.mrb[20].mxu0  ;;  %3544 = vmatmul.mubr.msk.f32.gmra.mrb[16].mxu1 %vm889_vm2, %v843_v40 }
 0x129   : > { %v597_v43 = vadd.f32 %v3463_v42, %v4239_v23  ;;  %v591_v44 = vpop.f32.mrb[21].mxu0  ;;  %v845_v48 = vsel %vm749_vm4, %v587_v35, %v797_v39 }
 0x12a   : > { %v592_v45 = vadd.f32 %v4239_v23, %v591_v44  ;;  %v844_v46 = vsel %vm748_vm5, %v582_v37, %v796_v41 }
 0x12b   : > { %v799_v47 = vmul.f32 0.01, %v597_v43  ;;  %3546 = vmatprep.mubr.msk.f32.mxu1 %vm889_vm2, %v844_v46  ;;  %vm751_vm6 = vcmp.ge.f32.partialorder %v597_v43, 0.0 }
 0x12c   : > { %vm750_vm7 = vcmp.ge.f32.partialorder %v592_v45, 0.0  ;;  %v798_v49 = vmul.f32 0.01, %v592_v45  ;;  %v3466_v50 = vpop.f32.mrb[22].mxu0  ;;  %3547 = vmatmul.mubr.msk.f32.gmra.mrb[18].mxu1 %vm889_vm2, %v845_v48 }
 0x12d   : > { %v607_v51 = vadd.f32 %v3466_v50, %v4239_v23  ;;  %v601_v52 = vpop.f32.mrb[23].mxu0  ;;  %v847_v56 = vsel %vm751_vm6, %v597_v43, %v799_v47 }
 0x12e   : > { %v602_v53 = vadd.f32 %v4239_v23, %v601_v52  ;;  %v846_v54 = vsel %vm750_vm7, %v592_v45, %v798_v49 }
 0x12f   : > { %v801_v55 = vmul.f32 0.01, %v607_v51  ;;  %3549 = vmatprep.mubr.msk.f32.mxu1 %vm889_vm2, %v846_v54  ;;  %vm753_vm8 = vcmp.ge.f32.partialorder %v607_v51, 0.0 }
 0x130   : > { %vm752_vm9 = vcmp.ge.f32.partialorder %v602_v53, 0.0  ;;  %v800_v57 = vmul.f32 0.01, %v602_v53  ;;  %v3469_v58 = vpop.f32.mrb[24].mxu0  ;;  %3550 = vmatmul.mubr.msk.f32.gmra.mrb[20].mxu1 %vm889_vm2, %v847_v56 }
 0x131   : > { %v617_v59 = vadd.f32 %v3469_v58, %v4239_v23  ;;  %v611_v60 = vpop.f32.mrb[25].mxu0  ;;  %v849_v0 = vsel %vm753_vm8, %v607_v51, %v801_v55 }
 0x132   : > { %v612_v61 = vadd.f32 %v4239_v23, %v611_v60  ;;  %v848_v62 = vsel %vm752_vm9, %v602_v53, %v800_v57 }
 0x133   : > { %v803_v63 = vmul.f32 0.01, %v617_v59  ;;  %3552 = vmatprep.mubr.msk.f32.mxu1 %vm889_vm2, %v848_v62  ;;  %vm755_vm10 = vcmp.ge.f32.partialorder %v617_v59, 0.0 }
 0x134   : > { %vm754_vm11 = vcmp.ge.f32.partialorder %v612_v61, 0.0  ;;  %v802_v1 = vmul.f32 0.01, %v612_v61  ;;  %v3472_v2 = vpop.f32.mrb[26].mxu0  ;;  %3553 = vmatmul.mubr.msk.f32.gmra.mrb[22].mxu1 %vm889_vm2, %v849_v0 }
 0x135   : > { %v627_v3 = vadd.f32 %v3472_v2, %v4239_v23  ;;  %v621_v4 = vpop.f32.mrb[27].mxu0  ;;  %v851_v8 = vsel %vm755_vm10, %v617_v59, %v803_v63 }
 0x136   : > { %v622_v5 = vadd.f32 %v4239_v23, %v621_v4  ;;  %v850_v6 = vsel %vm754_vm11, %v612_v61, %v802_v1 }
 0x137   : > { %v805_v7 = vmul.f32 0.01, %v627_v3  ;;  %3555 = vmatprep.mubr.msk.f32.mxu1 %vm889_vm2, %v850_v6  ;;  %vm757_vm12 = vcmp.ge.f32.partialorder %v627_v3, 0.0 }
 0x138   : > { %vm756_vm13 = vcmp.ge.f32.partialorder %v622_v5, 0.0  ;;  %v804_v9 = vmul.f32 0.01, %v622_v5  ;;  %v3475_v10 = vpop.f32.mrb[28].mxu0  ;;  %3556 = vmatmul.mubr.msk.f32.gmra.mrb[24].mxu1 %vm889_vm2, %v851_v8 }
 0x139   : > { %v637_v11 = vadd.f32 %v3475_v10, %v4239_v23  ;;  %v631_v12 = vpop.f32.mrb[29].mxu0  ;;  %v853_v16 = vsel %vm757_vm12, %v627_v3, %v805_v7 }
 0x13a   : > { %v632_v13 = vadd.f32 %v4239_v23, %v631_v12  ;;  %v852_v14 = vsel %vm756_vm13, %v622_v5, %v804_v9 }
 0x13b   : > { %v807_v15 = vmul.f32 0.01, %v637_v11  ;;  %3558 = vmatprep.mubr.msk.f32.mxu1 %vm889_vm2, %v852_v14  ;;  %vm759_vm14 = vcmp.ge.f32.partialorder %v637_v11, 0.0 }
 0x13c   : > { %vm758_vm15 = vcmp.ge.f32.partialorder %v632_v13, 0.0  ;;  %v806_v17 = vmul.f32 0.01, %v632_v13  ;;  %v3478_v18 = vpop.f32.mrb[30].mxu0  ;;  %3559 = vmatmul.mubr.msk.f32.gmra.mrb[26].mxu1 %vm889_vm2, %v853_v16 }
 0x13d   : > { %v647_v19 = vadd.f32 %v3478_v18, %v4239_v23  ;;  %v641_v20 = vpop.f32.mrb[31].mxu0  ;;  %v855_v25 = vsel %vm759_vm14, %v637_v11, %v807_v15 }
 0x13e   : > { %v642_v21 = vadd.f32 %v4239_v23, %v641_v20  ;;  %v854_v22 = vsel %vm758_vm15, %v632_v13, %v806_v17 }
 0x13f   : > { %v809_v24 = vmul.f32 0.01, %v647_v19  ;;  %3561 = vmatprep.mubr.msk.f32.mxu1 %vm889_vm2, %v854_v22  ;;  %vm761_vm0 = vcmp.ge.f32.partialorder %v647_v19, 0.0 }
 0x140   : > { %vm760_vm1 = vcmp.ge.f32.partialorder %v642_v21, 0.0  ;;  %v808_v26 = vmul.f32 0.01, %v642_v21  ;;  %v3481_v27 = vpop.f32.mrb[32].mxu0  ;;  %3562 = vmatmul.mubr.msk.f32.gmra.mrb[28].mxu1 %vm889_vm2, %v855_v25 }
 0x141   : > { %v657_v28 = vadd.f32 %v3481_v27, %v4239_v23  ;;  %v651_v29 = vpop.f32.mrb[33].mxu0  ;;  %v857_v33 = vsel %vm761_vm0, %v647_v19, %v809_v24 }
 0x142   : > { %v652_v30 = vadd.f32 %v4239_v23, %v651_v29  ;;  %v856_v31 = vsel %vm760_vm1, %v642_v21, %v808_v26 }
 0x143   : > { %v811_v32 = vmul.f32 0.01, %v657_v28  ;;  %3564 = vmatprep.mubr.msk.f32.mxu1 %vm889_vm2, %v856_v31  ;;  %vm763_vm3 = vcmp.ge.f32.partialorder %v657_v28, 0.0  ;;  %v2090_v31 = vld [vmem:[%s4855_s7 + $0x10] sm:$0xff] }
 0x144   : > { %vm762_vm4 = vcmp.ge.f32.partialorder %v652_v30, 0.0  ;;  %v810_v34 = vmul.f32 0.01, %v652_v30  ;;  %v3484_v35 = vpop.f32.mrb[34].mxu0  ;;  %3565 = vmatmul.mubr.msk.f32.gmra.mrb[30].mxu1 %vm889_vm2, %v857_v33  ;;  %v2091_v33 = vld [vmem:[%s4855_s7 + $0x18] sm:$0xff] }
 0x145   : > { %v667_v36 = vadd.f32 %v3484_v35, %v4239_v23  ;;  %v661_v37 = vpop.f32.mrb[35].mxu0  ;;  %v859_v41 = vsel %vm763_vm3, %v657_v28, %v811_v32  ;;  %v2092_v35 = vld [vmem:[%s4855_s7 + $0x20] sm:$0xff] }
 0x146   : > { %v662_v38 = vadd.f32 %v4239_v23, %v661_v37  ;;  %v858_v39 = vsel %vm762_vm4, %v652_v30, %v810_v34  ;;  %v2089_v30 = vld [vmem:[%s4855_s7 + $0x8] sm:$0xff]  ;;  %v3819_v34 = vpack.c.bf16 %v2091_v33, %v2090_v31 }
 0x147   : > { %v813_v40 = vmul.f32 0.01, %v667_v36  ;;  %3567 = vmatprep.mubr.msk.f32.mxu1 %vm889_vm2, %v858_v39  ;;  %vm765_vm5 = vcmp.ge.f32.partialorder %v667_v36, 0.0  ;;  %v2095_v39 = vld [vmem:[%s4855_s7 + $0x38] sm:$0xff] }
 0x148   : > { %vm764_vm6 = vcmp.ge.f32.partialorder %v662_v38, 0.0  ;;  %v812_v42 = vmul.f32 0.01, %v662_v38  ;;  %v3487_v43 = vpop.f32.mrb[36].mxu0  ;;  %3568 = vmatmul.mubr.msk.f32.gmra.mrb[32].mxu1 %vm889_vm2, %v859_v41  ;;  %v4374_v41 = vld [vmem:[%s4852_s4] ss:$0 sm:$0xff] }
 0x149   : > { %v677_v44 = vadd.f32 %v3487_v43, %v4239_v23  ;;  %v671_v45 = vpop.f32.mrb[37].mxu0  ;;  %v861_v49 = vsel %vm765_vm5, %v667_v36, %v813_v40  ;;  %v2093_v36 = vld [vmem:[%s4855_s7 + $0x28] sm:$0xff] }
 0x14a   : > { %v672_v46 = vadd.f32 %v4239_v23, %v671_v45  ;;  %v860_v47 = vsel %vm764_vm6, %v662_v38, %v812_v42  ;;  %v3823_v37 = vpack.c.bf16 %v2093_v36, %v2092_v35  ;;  %v2094_v38 = vld [vmem:[%s4855_s7 + $0x30] sm:$0xff]  ;;  %vm1494_vm6 = vcmask 261120  }
 0x14b   : > { %v815_v48 = vmul.f32 0.01, %v677_v44  ;;  %3570 = vmatprep.mubr.msk.f32.mxu1 %vm889_vm2, %v860_v47  ;;  %vm767_vm7 = vcmp.ge.f32.partialorder %v677_v44, 0.0  ;;  %v4367_v40 = vpack.c.bf16 %v2095_v39, %v2094_v38 }
 0x14c   : > { %vm766_vm8 = vcmp.ge.f32.partialorder %v672_v46, 0.0  ;;  %v814_v50 = vmul.f32 0.01, %v672_v46  ;;  %v3490_v51 = vpop.f32.mrb[38].mxu0  ;;  %3571 = vmatmul.mubr.msk.f32.gmra.mrb[34].mxu1 %vm889_vm2, %v861_v49 }
 0x14d   : > { %v687_v52 = vadd.f32 %v3490_v51, %v4239_v23  ;;  %v681_v53 = vpop.f32.mrb[39].mxu0  ;;  %v863_v57 = vsel %vm767_vm7, %v677_v44, %v815_v48 }
 0x14e   : > { %v682_v54 = vadd.f32 %v4239_v23, %v681_v53  ;;  %v862_v55 = vsel %vm766_vm8, %v672_v46, %v814_v50 }
 0x14f   : > { %v817_v56 = vmul.f32 0.01, %v687_v52  ;;  %3573 = vmatprep.mubr.msk.f32.mxu1 %vm889_vm2, %v862_v55  ;;  %vm769_vm9 = vcmp.ge.f32.partialorder %v687_v52, 0.0 }
 0x150   : > { %vm768_vm10 = vcmp.ge.f32.partialorder %v682_v54, 0.0  ;;  %v816_v58 = vmul.f32 0.01, %v682_v54  ;;  %v3493_v59 = vpop.f32.mrb[40].mxu0  ;;  %3574 = vmatmul.mubr.msk.f32.gmra.mrb[36].mxu1 %vm889_vm2, %v863_v57 }
 0x151   : > { %v697_v60 = vadd.f32 %v3493_v59, %v4239_v23  ;;  %v691_v61 = vpop.f32.mrb[41].mxu0  ;;  %v865_v1 = vsel %vm769_vm9, %v687_v52, %v817_v56 }
 0x152   : > { %v692_v62 = vadd.f32 %v4239_v23, %v691_v61  ;;  %v864_v63 = vsel %vm768_vm10, %v682_v54, %v816_v58 }
 0x153   : > { %v819_v0 = vmul.f32 0.01, %v697_v60  ;;  %3576 = vmatprep.mubr.msk.f32.mxu1 %vm889_vm2, %v864_v63  ;;  %vm771_vm11 = vcmp.ge.f32.partialorder %v697_v60, 0.0 }
 0x154   : > { %vm770_vm12 = vcmp.ge.f32.partialorder %v692_v62, 0.0  ;;  %v818_v2 = vmul.f32 0.01, %v692_v62  ;;  %v3496_v3 = vpop.f32.mrb[42].mxu0  ;;  %3577 = vmatmul.mubr.msk.f32.gmra.mrb[38].mxu1 %vm889_vm2, %v865_v1 }
 0x155   : > { %v707_v4 = vadd.f32 %v3496_v3, %v4239_v23  ;;  %v701_v5 = vpop.f32.mrb[43].mxu0  ;;  %v867_v9 = vsel %vm771_vm11, %v697_v60, %v819_v0 }
 0x156   : > { %v702_v6 = vadd.f32 %v4239_v23, %v701_v5  ;;  %v866_v7 = vsel %vm770_vm12, %v692_v62, %v818_v2 }
 0x157   : > { %v821_v8 = vmul.f32 0.01, %v707_v4  ;;  %3579 = vmatprep.mubr.msk.f32.mxu1 %vm889_vm2, %v866_v7  ;;  %vm773_vm13 = vcmp.ge.f32.partialorder %v707_v4, 0.0 }
 0x158   : > { %vm772_vm14 = vcmp.ge.f32.partialorder %v702_v6, 0.0  ;;  %v820_v10 = vmul.f32 0.01, %v702_v6  ;;  %v3499_v11 = vpop.f32.mrb[44].mxu0  ;;  %3580 = vmatmul.mubr.msk.f32.gmra.mrb[40].mxu1 %vm889_vm2, %v867_v9 }
 0x159   : > { %v717_v12 = vadd.f32 %v3499_v11, %v4239_v23  ;;  %v711_v13 = vpop.f32.mrb[45].mxu0  ;;  %v869_v17 = vsel %vm773_vm13, %v707_v4, %v821_v8 }
 0x15a   : > { %v712_v14 = vadd.f32 %v4239_v23, %v711_v13  ;;  %v868_v15 = vsel %vm772_vm14, %v702_v6, %v820_v10 }
 0x15b   : > { %v823_v16 = vmul.f32 0.01, %v717_v12  ;;  %3582 = vmatprep.mubr.msk.f32.mxu1 %vm889_vm2, %v868_v15  ;;  %vm775_vm15 = vcmp.ge.f32.partialorder %v717_v12, 0.0 }
 0x15c   : > { %vm774_vm0 = vcmp.ge.f32.partialorder %v712_v14, 0.0  ;;  %v822_v18 = vmul.f32 0.01, %v712_v14  ;;  %v3502_v19 = vpop.f32.mrb[46].mxu0  ;;  %3583 = vmatmul.mubr.msk.f32.gmra.mrb[42].mxu1 %vm889_vm2, %v869_v17 }
 0x15d   : > { %v727_v20 = vadd.f32 %v3502_v19, %v4239_v23  ;;  %v721_v21 = vpop.f32.mrb[47].mxu0  ;;  %v871_v26 = vsel %vm775_vm15, %v717_v12, %v823_v16 }
 0x15e   : > { %v722_v22 = vadd.f32 %v4239_v23, %v721_v21  ;;  %v870_v24 = vsel %vm774_vm0, %v712_v14, %v822_v18  ;;  %v2088_v23 = vld [vmem:[%s4855_s7] sm:$0xff] }
 0x15f   : > { %v825_v25 = vmul.f32 0.01, %v727_v20  ;;  %3585 = vmatprep.mubr.msk.f32.mxu1 %vm889_vm2, %v870_v24  ;;  %vm777_vm1 = vcmp.ge.f32.partialorder %v727_v20, 0.0  ;;  %v3815_v32 = vpack.c.bf16 %v2089_v30, %v2088_v23 }
 0x160   : > { %vm776_vm3 = vcmp.ge.f32.partialorder %v722_v22, 0.0  ;;  %v824_v27 = vmul.f32 0.01, %v722_v22  ;;  %3586 = vmatmul.mubr.msk.f32.gmra.mrb[44].mxu1 %vm889_vm2, %v871_v26 }
 0x161   : > { %v873_v29 = vsel %vm777_vm1, %v727_v20, %v825_v25  ;;  %3816 = vmatprep.subr.bf16.mxu0 %v3815_v32  ;;  %3831 = vmatprep.subr.bf16.mxu1 %v3815_v32 }
 0x162   : > { %v872_v28 = vsel %vm776_vm3, %v722_v22, %v824_v27  ;;  %3818 = vmatpush3.bf16.msra.mxu0 %v3815_v32 }
 0x163   : > { %3588 = vmatprep.mubr.msk.f32.mxu1 %vm889_vm2, %v872_v28  ;;  %3820 = vmatprep.subr.bf16.mxu0 %v3819_v34 }
 0x164   : > { %3589 = vmatmul.mubr.msk.f32.gmra.mrb[46].mxu1 %vm889_vm2, %v873_v29 }
 0x166   : > { %3822 = vmatpush3.bf16.msra.mxu0 %v3819_v34 }
 0x167   : > { %3824 = vmatprep.subr.bf16.mxu0 %v3823_v37 }
 0x16a   : > { %3826 = vmatpush3.bf16.msra.mxu0 %v3823_v37 }
 0x16b   : > { %3828 = vmatprep.subr.bf16.mxu0 %v4367_v40 }
 0x16e   : > { %3830 = vmatpush3.bf16.msra.mxu0 %v4367_v40 }
 0x1db   : > { %v3521_v42 = vpop.f32.mrb[0].mxu1 }
 0x1dc   : > { %v1106_v43 = vadd.f32 %v3521_v42, %v4374_v41  ;;  %v1100_v44 = vpop.f32.mrb[1].mxu1 }
 0x1dd   : > { %v1101_v45 = vadd.f32 %v4374_v41, %v1100_v44 }
 0x1de   : > { %v1388_v46 = vmul.f32 0.01, %v1106_v43  ;;  %vm1340_vm4 = vcmp.ge.f32.partialorder %v1106_v43, 0.0 }
 0x1df   : > { %vm1339_vm5 = vcmp.ge.f32.partialorder %v1101_v45, 0.0  ;;  %v1387_v47 = vmul.f32 0.01, %v1101_v45  ;;  %v3524_v48 = vpop.f32.mrb[2].mxu1 }
 0x1e0   : > { %v1116_v49 = vadd.f32 %v3524_v48, %v4374_v41  ;;  %v1110_v50 = vpop.f32.mrb[3].mxu1  ;;  %v1436_v53 = vsel %vm1340_vm4, %v1106_v43, %v1388_v46 }
 0x1e1   : > { %v1111_v51 = vadd.f32 %v4374_v41, %v1110_v50  ;;  %v1435_v52 = vsel %vm1339_vm5, %v1101_v45, %v1387_v47 }
 0x1e2   : > { %v1390_v54 = vmul.f32 0.01, %v1116_v49  ;;  %3599 = vmatprep.mubr.msk.f32.mxu1 %vm1494_vm6, %v1435_v52  ;;  %vm1342_vm7 = vcmp.ge.f32.partialorder %v1116_v49, 0.0 }
 0x1e3   : > { %vm1341_vm8 = vcmp.ge.f32.partialorder %v1111_v51, 0.0  ;;  %v1389_v55 = vmul.f32 0.01, %v1111_v51  ;;  %v3527_v56 = vpop.f32.mrb[4].mxu1  ;;  %3600 = vmatmul.mubr.msk.f32.vlgmr.msra.gmra.mrb[48].mxu1 %vm1494_vm6, %v1436_v53 }
 0x1e4   : > { %v1126_v57 = vadd.f32 %v3527_v56, %v4374_v41  ;;  %v1120_v58 = vpop.f32.mrb[5].mxu1  ;;  %3835 = vmatpush3.bf16.msra.mxu1 %v3815_v32  ;;  %v1438_v62 = vsel %vm1342_vm7, %v1116_v49, %v1390_v54 }
 0x1e5   : > { %v1121_v59 = vadd.f32 %v4374_v41, %v1120_v58  ;;  %v1437_v60 = vsel %vm1341_vm8, %v1111_v51, %v1389_v55  ;;  %3832 = vmatprep.subr.bf16.mxu1 %v3819_v34 }
 0x1e6   : > { %v1392_v61 = vmul.f32 0.01, %v1126_v57  ;;  %3602 = vmatprep.mubr.msk.f32.mxu1 %vm1494_vm6, %v1437_v60  ;;  %vm1344_vm9 = vcmp.ge.f32.partialorder %v1126_v57, 0.0 }
 0x1e7   : > { %vm1343_vm10 = vcmp.ge.f32.partialorder %v1121_v59, 0.0  ;;  %v1391_v63 = vmul.f32 0.01, %v1121_v59  ;;  %v3530_v0 = vpop.f32.mrb[6].mxu1  ;;  %3603 = vmatmul.mubr.msk.f32.gmra.mrb[50].mxu1 %vm1494_vm6, %v1438_v62 }
 0x1e8   : > { %v1136_v1 = vadd.f32 %v3530_v0, %v4374_v41  ;;  %v1130_v2 = vpop.f32.mrb[7].mxu1  ;;  %3836 = vmatpush3.bf16.msra.mxu1 %v3819_v34  ;;  %v1440_v6 = vsel %vm1344_vm9, %v1126_v57, %v1392_v61 }
 0x1e9   : > { %v1131_v3 = vadd.f32 %v4374_v41, %v1130_v2  ;;  %v1439_v4 = vsel %vm1343_vm10, %v1121_v59, %v1391_v63  ;;  %3833 = vmatprep.subr.bf16.mxu1 %v3823_v37 }
 0x1ea   : > { %v1394_v5 = vmul.f32 0.01, %v1136_v1  ;;  %3605 = vmatprep.mubr.msk.f32.mxu1 %vm1494_vm6, %v1439_v4  ;;  %vm1346_vm11 = vcmp.ge.f32.partialorder %v1136_v1, 0.0 }
 0x1eb   : > { %vm1345_vm12 = vcmp.ge.f32.partialorder %v1131_v3, 0.0  ;;  %v1393_v7 = vmul.f32 0.01, %v1131_v3  ;;  %v3533_v8 = vpop.f32.mrb[8].mxu1  ;;  %3606 = vmatmul.mubr.msk.f32.gmra.mrb[52].mxu1 %vm1494_vm6, %v1440_v6 }
 0x1ec   : > { %v1146_v9 = vadd.f32 %v3533_v8, %v4374_v41  ;;  %v1140_v10 = vpop.f32.mrb[9].mxu1  ;;  %3837 = vmatpush3.bf16.msra.mxu1 %v3823_v37  ;;  %v1442_v14 = vsel %vm1346_vm11, %v1136_v1, %v1394_v5 }
 0x1ed   : > { %v1141_v11 = vadd.f32 %v4374_v41, %v1140_v10  ;;  %v1441_v12 = vsel %vm1345_vm12, %v1131_v3, %v1393_v7  ;;  %3834 = vmatprep.subr.bf16.mxu1 %v4367_v40 }
 0x1ee   : > { %v1396_v13 = vmul.f32 0.01, %v1146_v9  ;;  %3608 = vmatprep.mubr.msk.f32.mxu1 %vm1494_vm6, %v1441_v12  ;;  %vm1348_vm13 = vcmp.ge.f32.partialorder %v1146_v9, 0.0 }
 0x1ef   : > { %vm1347_vm14 = vcmp.ge.f32.partialorder %v1141_v11, 0.0  ;;  %v1395_v15 = vmul.f32 0.01, %v1141_v11  ;;  %v3536_v16 = vpop.f32.mrb[10].mxu1  ;;  %3609 = vmatmul.mubr.msk.f32.gmra.mrb[54].mxu1 %vm1494_vm6, %v1442_v14 }
 0x1f0   : > { %v1156_v17 = vadd.f32 %v3536_v16, %v4374_v41  ;;  %v1150_v18 = vpop.f32.mrb[11].mxu1  ;;  %3838 = vmatpush3.bf16.msra.mxu1 %v4367_v40  ;;  %v1444_v22 = vsel %vm1348_vm13, %v1146_v9, %v1396_v13 }
 0x1f1   : > { %v1151_v19 = vadd.f32 %v4374_v41, %v1150_v18  ;;  %v1443_v20 = vsel %vm1347_vm14, %v1141_v11, %v1395_v15 }
 0x1f2   : > { %v1398_v21 = vmul.f32 0.01, %v1156_v17  ;;  %3611 = vmatprep.mubr.msk.f32.mxu1 %vm1494_vm6, %v1443_v20  ;;  %vm1350_vm15 = vcmp.ge.f32.partialorder %v1156_v17, 0.0 }
 0x1f3   : > { %vm1349_vm0 = vcmp.ge.f32.partialorder %v1151_v19, 0.0  ;;  %v1397_v24 = vmul.f32 0.01, %v1151_v19  ;;  %v3539_v25 = vpop.f32.mrb[12].mxu1  ;;  %3612 = vmatmul.mubr.msk.f32.gmra.mrb[56].mxu1 %vm1494_vm6, %v1444_v22 }
 0x1f4   : > { %v1166_v26 = vadd.f32 %v3539_v25, %v4374_v41  ;;  %v1160_v27 = vpop.f32.mrb[13].mxu1  ;;  %v1446_v30 = vsel %vm1350_vm15, %v1156_v17, %v1398_v21 }
 0x1f5   : > { %v1161_v28 = vadd.f32 %v4374_v41, %v1160_v27  ;;  %v1445_v29 = vsel %vm1349_vm0, %v1151_v19, %v1397_v24 }
 0x1f6   : > { %v1400_v23 = vmul.f32 0.01, %v1166_v26  ;;  %3614 = vmatprep.mubr.msk.f32.mxu1 %vm1494_vm6, %v1445_v29  ;;  %vm1352_vm1 = vcmp.ge.f32.partialorder %v1166_v26, 0.0 }
 0x1f7   : > { %vm1351_vm3 = vcmp.ge.f32.partialorder %v1161_v28, 0.0  ;;  %v1399_v31 = vmul.f32 0.01, %v1161_v28  ;;  %v3542_v32 = vpop.f32.mrb[14].mxu1  ;;  %3615 = vmatmul.mubr.msk.f32.gmra.mrb[58].mxu1 %vm1494_vm6, %v1446_v30 }
 0x1f8   : > { %v1176_v33 = vadd.f32 %v3542_v32, %v4374_v41  ;;  %v1170_v34 = vpop.f32.mrb[15].mxu1  ;;  %v1448_v38 = vsel %vm1352_vm1, %v1166_v26, %v1400_v23 }
 0x1f9   : > { %v1171_v35 = vadd.f32 %v4374_v41, %v1170_v34  ;;  %v1447_v36 = vsel %vm1351_vm3, %v1161_v28, %v1399_v31 }
 0x1fa   : > { %v1402_v37 = vmul.f32 0.01, %v1176_v33  ;;  %3617 = vmatprep.mubr.msk.f32.mxu1 %vm1494_vm6, %v1447_v36  ;;  %vm1354_vm4 = vcmp.ge.f32.partialorder %v1176_v33, 0.0 }
 0x1fb   : > { %vm1353_vm5 = vcmp.ge.f32.partialorder %v1171_v35, 0.0  ;;  %v1401_v39 = vmul.f32 0.01, %v1171_v35  ;;  %v3545_v40 = vpop.f32.mrb[16].mxu1  ;;  %3618 = vmatmul.mubr.msk.f32.gmra.mrb[60].mxu1 %vm1494_vm6, %v1448_v38 }
 0x1fc   : > { %v1186_v42 = vadd.f32 %v3545_v40, %v4374_v41  ;;  %v1180_v43 = vpop.f32.mrb[17].mxu1  ;;  %v1450_v47 = vsel %vm1354_vm4, %v1176_v33, %v1402_v37 }
 0x1fd   : > { %v1181_v44 = vadd.f32 %v4374_v41, %v1180_v43  ;;  %v1449_v45 = vsel %vm1353_vm5, %v1171_v35, %v1401_v39 }
 0x1fe   : > { %v1404_v46 = vmul.f32 0.01, %v1186_v42  ;;  %3620 = vmatprep.mubr.msk.f32.mxu1 %vm1494_vm6, %v1449_v45  ;;  %vm1356_vm7 = vcmp.ge.f32.partialorder %v1186_v42, 0.0 }
 0x1ff   : > { %vm1355_vm8 = vcmp.ge.f32.partialorder %v1181_v44, 0.0  ;;  %v1403_v48 = vmul.f32 0.01, %v1181_v44  ;;  %v3548_v49 = vpop.f32.mrb[18].mxu1  ;;  %3621 = vmatmul.mubr.msk.f32.gmra.mrb[62].mxu1 %vm1494_vm6, %v1450_v47 }
 0x200   : > { %v1196_v50 = vadd.f32 %v3548_v49, %v4374_v41  ;;  %v1190_v51 = vpop.f32.mrb[19].mxu1  ;;  %v1452_v55 = vsel %vm1356_vm7, %v1186_v42, %v1404_v46 }
 0x201   : > { %v1191_v52 = vadd.f32 %v4374_v41, %v1190_v51  ;;  %v1451_v53 = vsel %vm1355_vm8, %v1181_v44, %v1403_v48 }
 0x202   : > { %v1406_v54 = vmul.f32 0.01, %v1196_v50  ;;  %3623 = vmatprep.mubr.msk.f32.mxu1 %vm1494_vm6, %v1451_v53  ;;  %vm1358_vm9 = vcmp.ge.f32.partialorder %v1196_v50, 0.0 }
 0x203   : > { %vm1357_vm10 = vcmp.ge.f32.partialorder %v1191_v52, 0.0  ;;  %v1405_v56 = vmul.f32 0.01, %v1191_v52  ;;  %v3551_v57 = vpop.f32.mrb[20].mxu1  ;;  %3624 = vmatmul.mubr.msk.f32.gmra.mrb[64].mxu1 %vm1494_vm6, %v1452_v55 }
 0x204   : > { %v1206_v58 = vadd.f32 %v3551_v57, %v4374_v41  ;;  %v1200_v59 = vpop.f32.mrb[21].mxu1  ;;  %v1454_v63 = vsel %vm1358_vm9, %v1196_v50, %v1406_v54 }
 0x205   : > { %v1201_v60 = vadd.f32 %v4374_v41, %v1200_v59  ;;  %v1453_v61 = vsel %vm1357_vm10, %v1191_v52, %v1405_v56 }
 0x206   : > { %v1408_v62 = vmul.f32 0.01, %v1206_v58  ;;  %3626 = vmatprep.mubr.msk.f32.mxu1 %vm1494_vm6, %v1453_v61  ;;  %vm1360_vm11 = vcmp.ge.f32.partialorder %v1206_v58, 0.0 }
 0x207   : > { %vm1359_vm12 = vcmp.ge.f32.partialorder %v1201_v60, 0.0  ;;  %v1407_v0 = vmul.f32 0.01, %v1201_v60  ;;  %v3554_v1 = vpop.f32.mrb[22].mxu1  ;;  %3627 = vmatmul.mubr.msk.f32.gmra.mrb[66].mxu1 %vm1494_vm6, %v1454_v63 }
 0x208   : > { %v1216_v2 = vadd.f32 %v3554_v1, %v4374_v41  ;;  %v1210_v3 = vpop.f32.mrb[23].mxu1  ;;  %v1456_v7 = vsel %vm1360_vm11, %v1206_v58, %v1408_v62 }
 0x209   : > { %v1211_v4 = vadd.f32 %v4374_v41, %v1210_v3  ;;  %v1455_v5 = vsel %vm1359_vm12, %v1201_v60, %v1407_v0 }
 0x20a   : > { %v1410_v6 = vmul.f32 0.01, %v1216_v2  ;;  %3629 = vmatprep.mubr.msk.f32.mxu1 %vm1494_vm6, %v1455_v5  ;;  %vm1362_vm13 = vcmp.ge.f32.partialorder %v1216_v2, 0.0 }
 0x20b   : > { %vm1361_vm14 = vcmp.ge.f32.partialorder %v1211_v4, 0.0  ;;  %v1409_v8 = vmul.f32 0.01, %v1211_v4  ;;  %v3557_v9 = vpop.f32.mrb[24].mxu1  ;;  %3630 = vmatmul.mubr.msk.f32.gmra.mrb[68].mxu1 %vm1494_vm6, %v1456_v7 }
 0x20c   : > { %v1226_v10 = vadd.f32 %v3557_v9, %v4374_v41  ;;  %v1220_v11 = vpop.f32.mrb[25].mxu1  ;;  %v1458_v15 = vsel %vm1362_vm13, %v1216_v2, %v1410_v6 }
 0x20d   : > { %v1221_v12 = vadd.f32 %v4374_v41, %v1220_v11  ;;  %v1457_v13 = vsel %vm1361_vm14, %v1211_v4, %v1409_v8 }
 0x20e   : > { %v1412_v14 = vmul.f32 0.01, %v1226_v10  ;;  %3632 = vmatprep.mubr.msk.f32.mxu1 %vm1494_vm6, %v1457_v13  ;;  %vm1364_vm15 = vcmp.ge.f32.partialorder %v1226_v10, 0.0 }
 0x20f   : > { %vm1363_vm0 = vcmp.ge.f32.partialorder %v1221_v12, 0.0  ;;  %v1411_v16 = vmul.f32 0.01, %v1221_v12  ;;  %v3560_v17 = vpop.f32.mrb[26].mxu1  ;;  %3633 = vmatmul.mubr.msk.f32.gmra.mrb[70].mxu1 %vm1494_vm6, %v1458_v15 }
 0x210   : > { %v1236_v18 = vadd.f32 %v3560_v17, %v4374_v41  ;;  %v1230_v19 = vpop.f32.mrb[27].mxu1  ;;  %v1460_v24 = vsel %vm1364_vm15, %v1226_v10, %v1412_v14 }
 0x211   : > { %v1231_v20 = vadd.f32 %v4374_v41, %v1230_v19  ;;  %v1459_v21 = vsel %vm1363_vm0, %v1221_v12, %v1411_v16 }
 0x212   : > { %v1414_v22 = vmul.f32 0.01, %v1236_v18  ;;  %3635 = vmatprep.mubr.msk.f32.mxu1 %vm1494_vm6, %v1459_v21  ;;  %vm1366_vm1 = vcmp.ge.f32.partialorder %v1236_v18, 0.0 }
 0x213   : > { %vm1365_vm3 = vcmp.ge.f32.partialorder %v1231_v20, 0.0  ;;  %v1413_v25 = vmul.f32 0.01, %v1231_v20  ;;  %v3563_v26 = vpop.f32.mrb[28].mxu1  ;;  %3636 = vmatmul.mubr.msk.f32.gmra.mrb[72].mxu1 %vm1494_vm6, %v1460_v24 }
 0x214   : > { %v1246_v27 = vadd.f32 %v3563_v26, %v4374_v41  ;;  %v1240_v28 = vpop.f32.mrb[29].mxu1  ;;  %v1462_v31 = vsel %vm1366_vm1, %v1236_v18, %v1414_v22 }
 0x215   : > { %v1241_v29 = vadd.f32 %v4374_v41, %v1240_v28  ;;  %v1461_v23 = vsel %vm1365_vm3, %v1231_v20, %v1413_v25 }
 0x216   : > { %v1416_v30 = vmul.f32 0.01, %v1246_v27  ;;  %3638 = vmatprep.mubr.msk.f32.mxu1 %vm1494_vm6, %v1461_v23  ;;  %vm1368_vm4 = vcmp.ge.f32.partialorder %v1246_v27, 0.0 }
 0x217   : > { %vm1367_vm5 = vcmp.ge.f32.partialorder %v1241_v29, 0.0  ;;  %v1415_v32 = vmul.f32 0.01, %v1241_v29  ;;  %v3566_v33 = vpop.f32.mrb[30].mxu1  ;;  %3639 = vmatmul.mubr.msk.f32.gmra.mrb[74].mxu1 %vm1494_vm6, %v1462_v31 }
 0x218   : > { %v1256_v34 = vadd.f32 %v3566_v33, %v4374_v41  ;;  %v1250_v35 = vpop.f32.mrb[31].mxu1  ;;  %v1464_v39 = vsel %vm1368_vm4, %v1246_v27, %v1416_v30 }
 0x219   : > { %v1251_v36 = vadd.f32 %v4374_v41, %v1250_v35  ;;  %v1463_v37 = vsel %vm1367_vm5, %v1241_v29, %v1415_v32 }
 0x21a   : > { %v1418_v38 = vmul.f32 0.01, %v1256_v34  ;;  %3641 = vmatprep.mubr.msk.f32.mxu1 %vm1494_vm6, %v1463_v37  ;;  %vm1370_vm7 = vcmp.ge.f32.partialorder %v1256_v34, 0.0 }
 0x21b   : > { %vm1369_vm8 = vcmp.ge.f32.partialorder %v1251_v36, 0.0  ;;  %v1417_v40 = vmul.f32 0.01, %v1251_v36  ;;  %v3569_v42 = vpop.f32.mrb[32].mxu1  ;;  %3642 = vmatmul.mubr.msk.f32.gmra.mrb[76].mxu1 %vm1494_vm6, %v1464_v39 }
 0x21c   : > { %v1266_v43 = vadd.f32 %v3569_v42, %v4374_v41  ;;  %v1260_v44 = vpop.f32.mrb[33].mxu1  ;;  %v1466_v48 = vsel %vm1370_vm7, %v1256_v34, %v1418_v38 }
 0x21d   : > { %v1261_v45 = vadd.f32 %v4374_v41, %v1260_v44  ;;  %v1465_v46 = vsel %vm1369_vm8, %v1251_v36, %v1417_v40 }
 0x21e   : > { %v1420_v47 = vmul.f32 0.01, %v1266_v43  ;;  %3644 = vmatprep.mubr.msk.f32.mxu1 %vm1494_vm6, %v1465_v46  ;;  %vm1372_vm9 = vcmp.ge.f32.partialorder %v1266_v43, 0.0 }
 0x21f   : > { %vm1371_vm10 = vcmp.ge.f32.partialorder %v1261_v45, 0.0  ;;  %v1419_v49 = vmul.f32 0.01, %v1261_v45  ;;  %v3572_v50 = vpop.f32.mrb[34].mxu1  ;;  %3645 = vmatmul.mubr.msk.f32.gmra.mrb[78].mxu1 %vm1494_vm6, %v1466_v48 }
 0x220   : > { %v1276_v51 = vadd.f32 %v3572_v50, %v4374_v41  ;;  %v1270_v52 = vpop.f32.mrb[35].mxu1  ;;  %v1468_v56 = vsel %vm1372_vm9, %v1266_v43, %v1420_v47 }
 0x221   : > { %v1271_v53 = vadd.f32 %v4374_v41, %v1270_v52  ;;  %v1467_v54 = vsel %vm1371_vm10, %v1261_v45, %v1419_v49 }
 0x222   : > { %v1422_v55 = vmul.f32 0.01, %v1276_v51  ;;  %3647 = vmatprep.mubr.msk.f32.mxu1 %vm1494_vm6, %v1467_v54  ;;  %vm1374_vm11 = vcmp.ge.f32.partialorder %v1276_v51, 0.0 }
 0x223   : > { %vm1373_vm12 = vcmp.ge.f32.partialorder %v1271_v53, 0.0  ;;  %v1421_v57 = vmul.f32 0.01, %v1271_v53  ;;  %v3575_v58 = vpop.f32.mrb[36].mxu1  ;;  %3648 = vmatmul.mubr.msk.f32.gmra.mrb[80].mxu1 %vm1494_vm6, %v1468_v56 }
 0x224   : > { %v1286_v59 = vadd.f32 %v3575_v58, %v4374_v41  ;;  %v1280_v60 = vpop.f32.mrb[37].mxu1  ;;  %v1470_v0 = vsel %vm1374_vm11, %v1276_v51, %v1422_v55 }
 0x225   : > { %v1281_v61 = vadd.f32 %v4374_v41, %v1280_v60  ;;  %v1469_v62 = vsel %vm1373_vm12, %v1271_v53, %v1421_v57 }
 0x226   : > { %v1424_v63 = vmul.f32 0.01, %v1286_v59  ;;  %3650 = vmatprep.mubr.msk.f32.mxu1 %vm1494_vm6, %v1469_v62  ;;  %vm1376_vm13 = vcmp.ge.f32.partialorder %v1286_v59, 0.0 }
 0x227   : > { %vm1375_vm14 = vcmp.ge.f32.partialorder %v1281_v61, 0.0  ;;  %v1423_v1 = vmul.f32 0.01, %v1281_v61  ;;  %v3578_v2 = vpop.f32.mrb[38].mxu1  ;;  %3651 = vmatmul.mubr.msk.f32.gmra.mrb[82].mxu1 %vm1494_vm6, %v1470_v0 }
 0x228   : > { %v1296_v3 = vadd.f32 %v3578_v2, %v4374_v41  ;;  %v1290_v4 = vpop.f32.mrb[39].mxu1  ;;  %v1472_v8 = vsel %vm1376_vm13, %v1286_v59, %v1424_v63 }
 0x229   : > { %v1291_v5 = vadd.f32 %v4374_v41, %v1290_v4  ;;  %v1471_v6 = vsel %vm1375_vm14, %v1281_v61, %v1423_v1 }
 0x22a   : > { %v1426_v7 = vmul.f32 0.01, %v1296_v3  ;;  %3653 = vmatprep.mubr.msk.f32.mxu1 %vm1494_vm6, %v1471_v6  ;;  %vm1378_vm15 = vcmp.ge.f32.partialorder %v1296_v3, 0.0 }
 0x22b   : > { %vm1377_vm0 = vcmp.ge.f32.partialorder %v1291_v5, 0.0  ;;  %v1425_v9 = vmul.f32 0.01, %v1291_v5  ;;  %v3581_v10 = vpop.f32.mrb[40].mxu1  ;;  %3654 = vmatmul.mubr.msk.f32.gmra.mrb[84].mxu1 %vm1494_vm6, %v1472_v8 }
 0x22c   : > { %v1306_v11 = vadd.f32 %v3581_v10, %v4374_v41  ;;  %v1300_v12 = vpop.f32.mrb[41].mxu1  ;;  %v1474_v16 = vsel %vm1378_vm15, %v1296_v3, %v1426_v7 }
 0x22d   : > { %v1301_v13 = vadd.f32 %v4374_v41, %v1300_v12  ;;  %v1473_v14 = vsel %vm1377_vm0, %v1291_v5, %v1425_v9 }
 0x22e   : > { %v1428_v15 = vmul.f32 0.01, %v1306_v11  ;;  %3656 = vmatprep.mubr.msk.f32.mxu1 %vm1494_vm6, %v1473_v14  ;;  %vm1380_vm1 = vcmp.ge.f32.partialorder %v1306_v11, 0.0 }
 0x22f   : > { %vm1379_vm3 = vcmp.ge.f32.partialorder %v1301_v13, 0.0  ;;  %v1427_v17 = vmul.f32 0.01, %v1301_v13  ;;  %v3584_v18 = vpop.f32.mrb[42].mxu1  ;;  %3657 = vmatmul.mubr.msk.f32.gmra.mrb[86].mxu1 %vm1494_vm6, %v1474_v16 }
 0x230   : > { %v1316_v19 = vadd.f32 %v3584_v18, %v4374_v41  ;;  %v1310_v20 = vpop.f32.mrb[43].mxu1  ;;  %v1476_v25 = vsel %vm1380_vm1, %v1306_v11, %v1428_v15 }
 0x231   : > { %v1311_v21 = vadd.f32 %v4374_v41, %v1310_v20  ;;  %v1475_v22 = vsel %vm1379_vm3, %v1301_v13, %v1427_v17 }
 0x232   : > { %v1430_v24 = vmul.f32 0.01, %v1316_v19  ;;  %3659 = vmatprep.mubr.msk.f32.mxu1 %vm1494_vm6, %v1475_v22  ;;  %vm1382_vm4 = vcmp.ge.f32.partialorder %v1316_v19, 0.0 }
 0x233   : > { %vm1381_vm5 = vcmp.ge.f32.partialorder %v1311_v21, 0.0  ;;  %v1429_v26 = vmul.f32 0.01, %v1311_v21  ;;  %v3587_v27 = vpop.f32.mrb[44].mxu1  ;;  %3660 = vmatmul.mubr.msk.f32.gmra.mrb[88].mxu1 %vm1494_vm6, %v1476_v25 }
 0x234   : > { %v1326_v28 = vadd.f32 %v3587_v27, %v4374_v41  ;;  %v1320_v29 = vpop.f32.mrb[45].mxu1  ;;  %v1478_v32 = vsel %vm1382_vm4, %v1316_v19, %v1430_v24 }
 0x235   : > { %v1321_v23 = vadd.f32 %v4374_v41, %v1320_v29  ;;  %v1477_v30 = vsel %vm1381_vm5, %v1311_v21, %v1429_v26 }
 0x236   : > { %v1432_v31 = vmul.f32 0.01, %v1326_v28  ;;  %3662 = vmatprep.mubr.msk.f32.mxu1 %vm1494_vm6, %v1477_v30  ;;  %vm1384_vm7 = vcmp.ge.f32.partialorder %v1326_v28, 0.0 }
 0x237   : > { %vm1383_vm8 = vcmp.ge.f32.partialorder %v1321_v23, 0.0  ;;  %v1431_v33 = vmul.f32 0.01, %v1321_v23  ;;  %v3590_v34 = vpop.f32.mrb[46].mxu1  ;;  %3663 = vmatmul.mubr.msk.f32.gmra.mrb[90].mxu1 %vm1494_vm6, %v1478_v32 }
 0x238   : > { %v1336_v35 = vadd.f32 %v3590_v34, %v4374_v41  ;;  %v1330_v36 = vpop.f32.mrb[47].mxu1  ;;  %v1480_v40 = vsel %vm1384_vm7, %v1326_v28, %v1432_v31 }
 0x239   : > { %v1331_v37 = vadd.f32 %v4374_v41, %v1330_v36  ;;  %v1479_v38 = vsel %vm1383_vm8, %v1321_v23, %v1431_v33  ;;  %v4477_v41 = vld [vmem:[%s4854_s6] ss:$0 sm:$0xff] }
 0x23a   : > { %v1434_v39 = vmul.f32 0.01, %v1336_v35  ;;  %3665 = vmatprep.mubr.msk.f32.mxu1 %vm1494_vm6, %v1479_v38  ;;  %vm1386_vm9 = vcmp.ge.f32.partialorder %v1336_v35, 0.0 }
 0x23b   : > { %vm1385_vm10 = vcmp.ge.f32.partialorder %v1331_v37, 0.0  ;;  %v1433_v42 = vmul.f32 0.01, %v1331_v37  ;;  %3666 = vmatmul.mubr.msk.f32.gmra.mrb[92].mxu1 %vm1494_vm6, %v1480_v40 }
 0x23c   : > { %v1482_v44 = vsel %vm1386_vm9, %v1336_v35, %v1434_v39 }
 0x23d   : > { %v1481_v43 = vsel %vm1385_vm10, %v1331_v37, %v1433_v42 }
 0x23e   : > { %3668 = vmatprep.mubr.msk.f32.mxu1 %vm1494_vm6, %v1481_v43 }
 0x23f   : > { %3669 = vmatmul.mubr.msk.f32.gmra.mrb[94].mxu1 %vm1494_vm6, %v1482_v44 }
 0x2b6   : > { %v3601_v45 = vpop.f32.mrb[48].mxu1 }
 0x2b7   : > { %v1711_v46 = vadd.f32 %v3601_v45, %v4477_v41  ;;  %v1705_v47 = vpop.f32.mrb[49].mxu1 }
 0x2b8   : > { %v1706_v48 = vadd.f32 %v4477_v41, %v1705_v47 }
 0x2b9   : > { %v1993_v49 = vmul.f32 0.01, %v1711_v46  ;;  %vm1945_vm11 = vcmp.ge.f32.partialorder %v1711_v46, 0.0 }
 0x2ba   : > { %vm1944_vm12 = vcmp.ge.f32.partialorder %v1706_v48, 0.0  ;;  %v1992_v50 = vmul.f32 0.01, %v1706_v48  ;;  %v3604_v51 = vpop.f32.mrb[50].mxu1 }
 0x2bb   : > { %v1721_v52 = vadd.f32 %v3604_v51, %v4477_v41  ;;  %v1715_v53 = vpop.f32.mrb[51].mxu1  ;;  %v2041_v56 = vsel %vm1945_vm11, %v1711_v46, %v1993_v49 }
 0x2bc   : > { %v1716_v54 = vadd.f32 %v4477_v41, %v1715_v53  ;;  %v2040_v55 = vsel %vm1944_vm12, %v1706_v48, %v1992_v50 }
 0x2bd   : > { %v1995_v57 = vmul.f32 0.01, %v1721_v52  ;;  %3687 = vmatprep.mubr.msk.f32.mxu0 %vm889_vm2, %v2040_v55  ;;  %vm1947_vm6 = vcmp.ge.f32.partialorder %v1721_v52, 0.0 }
 0x2be   : > { %vm1946_vm13 = vcmp.ge.f32.partialorder %v1716_v54, 0.0  ;;  %v1994_v58 = vmul.f32 0.01, %v1716_v54  ;;  %v3607_v59 = vpop.f32.mrb[52].mxu1  ;;  %3688 = vmatmul.mubr.msk.f32.vlgmr.msra.gmra.mrb[48].mxu0 %vm889_vm2, %v2041_v56 }
 0x2bf   : > { %v1731_v60 = vadd.f32 %v3607_v59, %v4477_v41  ;;  %v1725_v61 = vpop.f32.mrb[53].mxu1  ;;  %v2043_v1 = vsel %vm1947_vm6, %v1721_v52, %v1995_v57 }
 0x2c0   : > { %v1726_v62 = vadd.f32 %v4477_v41, %v1725_v61  ;;  %v2042_v63 = vsel %vm1946_vm13, %v1716_v54, %v1994_v58 }
 0x2c1   : > { %v1997_v0 = vmul.f32 0.01, %v1731_v60  ;;  %3690 = vmatprep.mubr.msk.f32.mxu0 %vm889_vm2, %v2042_v63  ;;  %vm1949_vm14 = vcmp.ge.f32.partialorder %v1731_v60, 0.0 }
 0x2c2   : > { %vm1948_vm15 = vcmp.ge.f32.partialorder %v1726_v62, 0.0  ;;  %v1996_v2 = vmul.f32 0.01, %v1726_v62  ;;  %v3610_v3 = vpop.f32.mrb[54].mxu1  ;;  %3691 = vmatmul.mubr.msk.f32.gmra.mrb[50].mxu0 %vm889_vm2, %v2043_v1 }
 0x2c3   : > { %v1741_v4 = vadd.f32 %v3610_v3, %v4477_v41  ;;  %v1735_v5 = vpop.f32.mrb[55].mxu1  ;;  %v2045_v9 = vsel %vm1949_vm14, %v1731_v60, %v1997_v0 }
 0x2c4   : > { %v1736_v6 = vadd.f32 %v4477_v41, %v1735_v5  ;;  %v2044_v7 = vsel %vm1948_vm15, %v1726_v62, %v1996_v2 }
 0x2c5   : > { %v1999_v8 = vmul.f32 0.01, %v1741_v4  ;;  %3693 = vmatprep.mubr.msk.f32.mxu0 %vm889_vm2, %v2044_v7  ;;  %vm1951_vm0 = vcmp.ge.f32.partialorder %v1741_v4, 0.0 }
 0x2c6   : > { %vm1950_vm1 = vcmp.ge.f32.partialorder %v1736_v6, 0.0  ;;  %v1998_v10 = vmul.f32 0.01, %v1736_v6  ;;  %v3613_v11 = vpop.f32.mrb[56].mxu1  ;;  %3694 = vmatmul.mubr.msk.f32.gmra.mrb[52].mxu0 %vm889_vm2, %v2045_v9 }
 0x2c7   : > { %v1751_v12 = vadd.f32 %v3613_v11, %v4477_v41  ;;  %v1745_v13 = vpop.f32.mrb[57].mxu1  ;;  %v2047_v17 = vsel %vm1951_vm0, %v1741_v4, %v1999_v8 }
 0x2c8   : > { %v1746_v14 = vadd.f32 %v4477_v41, %v1745_v13  ;;  %v2046_v15 = vsel %vm1950_vm1, %v1736_v6, %v1998_v10 }
 0x2c9   : > { %v2001_v16 = vmul.f32 0.01, %v1751_v12  ;;  %3696 = vmatprep.mubr.msk.f32.mxu0 %vm889_vm2, %v2046_v15  ;;  %vm1953_vm3 = vcmp.ge.f32.partialorder %v1751_v12, 0.0 }
 0x2ca   : > { %vm1952_vm4 = vcmp.ge.f32.partialorder %v1746_v14, 0.0  ;;  %v2000_v18 = vmul.f32 0.01, %v1746_v14  ;;  %v3616_v19 = vpop.f32.mrb[58].mxu1  ;;  %3697 = vmatmul.mubr.msk.f32.gmra.mrb[54].mxu0 %vm889_vm2, %v2047_v17 }
 0x2cb   : > { %v1761_v20 = vadd.f32 %v3616_v19, %v4477_v41  ;;  %v1755_v21 = vpop.f32.mrb[59].mxu1  ;;  %v2049_v26 = vsel %vm1953_vm3, %v1751_v12, %v2001_v16 }
 0x2cc   : > { %v1756_v22 = vadd.f32 %v4477_v41, %v1755_v21  ;;  %v2048_v24 = vsel %vm1952_vm4, %v1746_v14, %v2000_v18 }
 0x2cd   : > { %v2003_v25 = vmul.f32 0.01, %v1761_v20  ;;  %3699 = vmatprep.mubr.msk.f32.mxu0 %vm889_vm2, %v2048_v24  ;;  %vm1955_vm5 = vcmp.ge.f32.partialorder %v1761_v20, 0.0 }
 0x2ce   : > { %vm1954_vm7 = vcmp.ge.f32.partialorder %v1756_v22, 0.0  ;;  %v2002_v27 = vmul.f32 0.01, %v1756_v22  ;;  %v3619_v28 = vpop.f32.mrb[60].mxu1  ;;  %3700 = vmatmul.mubr.msk.f32.gmra.mrb[56].mxu0 %vm889_vm2, %v2049_v26 }
 0x2cf   : > { %v1771_v29 = vadd.f32 %v3619_v28, %v4477_v41  ;;  %v1765_v23 = vpop.f32.mrb[61].mxu1  ;;  %v2051_v33 = vsel %vm1955_vm5, %v1761_v20, %v2003_v25 }
 0x2d0   : > { %v1766_v30 = vadd.f32 %v4477_v41, %v1765_v23  ;;  %v2050_v31 = vsel %vm1954_vm7, %v1756_v22, %v2002_v27 }
 0x2d1   : > { %v2005_v32 = vmul.f32 0.01, %v1771_v29  ;;  %3702 = vmatprep.mubr.msk.f32.mxu0 %vm889_vm2, %v2050_v31  ;;  %vm1957_vm8 = vcmp.ge.f32.partialorder %v1771_v29, 0.0 }
 0x2d2   : > { %vm1956_vm9 = vcmp.ge.f32.partialorder %v1766_v30, 0.0  ;;  %v2004_v34 = vmul.f32 0.01, %v1766_v30  ;;  %v3622_v35 = vpop.f32.mrb[62].mxu1  ;;  %3703 = vmatmul.mubr.msk.f32.gmra.mrb[58].mxu0 %vm889_vm2, %v2051_v33 }
 0x2d3   : > { %v1781_v36 = vadd.f32 %v3622_v35, %v4477_v41  ;;  %v1775_v37 = vpop.f32.mrb[63].mxu1  ;;  %v2053_v42 = vsel %vm1957_vm8, %v1771_v29, %v2005_v32 }
 0x2d4   : > { %v1776_v38 = vadd.f32 %v4477_v41, %v1775_v37  ;;  %v2052_v39 = vsel %vm1956_vm9, %v1766_v30, %v2004_v34 }
 0x2d5   : > { %v2007_v40 = vmul.f32 0.01, %v1781_v36  ;;  %3705 = vmatprep.mubr.msk.f32.mxu0 %vm889_vm2, %v2052_v39  ;;  %vm1959_vm10 = vcmp.ge.f32.partialorder %v1781_v36, 0.0 }
 0x2d6   : > { %vm1958_vm11 = vcmp.ge.f32.partialorder %v1776_v38, 0.0  ;;  %v2006_v43 = vmul.f32 0.01, %v1776_v38  ;;  %v3625_v44 = vpop.f32.mrb[64].mxu1  ;;  %3706 = vmatmul.mubr.msk.f32.gmra.mrb[60].mxu0 %vm889_vm2, %v2053_v42 }
 0x2d7   : > { %v1791_v45 = vadd.f32 %v3625_v44, %v4477_v41  ;;  %v1785_v46 = vpop.f32.mrb[65].mxu1  ;;  %v2055_v50 = vsel %vm1959_vm10, %v1781_v36, %v2007_v40 }
 0x2d8   : > { %v1786_v47 = vadd.f32 %v4477_v41, %v1785_v46  ;;  %v2054_v48 = vsel %vm1958_vm11, %v1776_v38, %v2006_v43 }
 0x2d9   : > { %v2009_v49 = vmul.f32 0.01, %v1791_v45  ;;  %3708 = vmatprep.mubr.msk.f32.mxu0 %vm889_vm2, %v2054_v48  ;;  %vm1961_vm12 = vcmp.ge.f32.partialorder %v1791_v45, 0.0 }
 0x2da   : > { %vm1960_vm6 = vcmp.ge.f32.partialorder %v1786_v47, 0.0  ;;  %v2008_v51 = vmul.f32 0.01, %v1786_v47  ;;  %v3628_v52 = vpop.f32.mrb[66].mxu1  ;;  %3709 = vmatmul.mubr.msk.f32.gmra.mrb[62].mxu0 %vm889_vm2, %v2055_v50 }
 0x2db   : > { %v1801_v53 = vadd.f32 %v3628_v52, %v4477_v41  ;;  %v1795_v54 = vpop.f32.mrb[67].mxu1  ;;  %v2057_v58 = vsel %vm1961_vm12, %v1791_v45, %v2009_v49 }
 0x2dc   : > { %v1796_v55 = vadd.f32 %v4477_v41, %v1795_v54  ;;  %v2056_v56 = vsel %vm1960_vm6, %v1786_v47, %v2008_v51 }
 0x2dd   : > { %v2011_v57 = vmul.f32 0.01, %v1801_v53  ;;  %3711 = vmatprep.mubr.msk.f32.mxu0 %vm889_vm2, %v2056_v56  ;;  %vm1963_vm13 = vcmp.ge.f32.partialorder %v1801_v53, 0.0 }
 0x2de   : > { %vm1962_vm14 = vcmp.ge.f32.partialorder %v1796_v55, 0.0  ;;  %v2010_v59 = vmul.f32 0.01, %v1796_v55  ;;  %v3631_v60 = vpop.f32.mrb[68].mxu1  ;;  %3712 = vmatmul.mubr.msk.f32.gmra.mrb[64].mxu0 %vm889_vm2, %v2057_v58 }
 0x2df   : > { %v1811_v61 = vadd.f32 %v3631_v60, %v4477_v41  ;;  %v1805_v62 = vpop.f32.mrb[69].mxu1  ;;  %v2059_v2 = vsel %vm1963_vm13, %v1801_v53, %v2011_v57 }
 0x2e0   : > { %v1806_v63 = vadd.f32 %v4477_v41, %v1805_v62  ;;  %v2058_v0 = vsel %vm1962_vm14, %v1796_v55, %v2010_v59 }
 0x2e1   : > { %v2013_v1 = vmul.f32 0.01, %v1811_v61  ;;  %3714 = vmatprep.mubr.msk.f32.mxu0 %vm889_vm2, %v2058_v0  ;;  %vm1965_vm15 = vcmp.ge.f32.partialorder %v1811_v61, 0.0 }
 0x2e2   : > { %vm1964_vm0 = vcmp.ge.f32.partialorder %v1806_v63, 0.0  ;;  %v2012_v3 = vmul.f32 0.01, %v1806_v63  ;;  %v3634_v4 = vpop.f32.mrb[70].mxu1  ;;  %3715 = vmatmul.mubr.msk.f32.gmra.mrb[66].mxu0 %vm889_vm2, %v2059_v2 }
 0x2e3   : > { %v1821_v5 = vadd.f32 %v3634_v4, %v4477_v41  ;;  %v1815_v6 = vpop.f32.mrb[71].mxu1  ;;  %v2061_v10 = vsel %vm1965_vm15, %v1811_v61, %v2013_v1 }
 0x2e4   : > { %v1816_v7 = vadd.f32 %v4477_v41, %v1815_v6  ;;  %v2060_v8 = vsel %vm1964_vm0, %v1806_v63, %v2012_v3 }
 0x2e5   : > { %v2015_v9 = vmul.f32 0.01, %v1821_v5  ;;  %3717 = vmatprep.mubr.msk.f32.mxu0 %vm889_vm2, %v2060_v8  ;;  %vm1967_vm1 = vcmp.ge.f32.partialorder %v1821_v5, 0.0 }
 0x2e6   : > { %vm1966_vm3 = vcmp.ge.f32.partialorder %v1816_v7, 0.0  ;;  %v2014_v11 = vmul.f32 0.01, %v1816_v7  ;;  %v3637_v12 = vpop.f32.mrb[72].mxu1  ;;  %3718 = vmatmul.mubr.msk.f32.gmra.mrb[68].mxu0 %vm889_vm2, %v2061_v10 }
 0x2e7   : > { %v1831_v13 = vadd.f32 %v3637_v12, %v4477_v41  ;;  %v1825_v14 = vpop.f32.mrb[73].mxu1  ;;  %v2063_v18 = vsel %vm1967_vm1, %v1821_v5, %v2015_v9 }
 0x2e8   : > { %v1826_v15 = vadd.f32 %v4477_v41, %v1825_v14  ;;  %v2062_v16 = vsel %vm1966_vm3, %v1816_v7, %v2014_v11 }
 0x2e9   : > { %v2017_v17 = vmul.f32 0.01, %v1831_v13  ;;  %3720 = vmatprep.mubr.msk.f32.mxu0 %vm889_vm2, %v2062_v16  ;;  %vm1969_vm4 = vcmp.ge.f32.partialorder %v1831_v13, 0.0 }
 0x2ea   : > { %vm1968_vm5 = vcmp.ge.f32.partialorder %v1826_v15, 0.0  ;;  %v2016_v19 = vmul.f32 0.01, %v1826_v15  ;;  %v3640_v20 = vpop.f32.mrb[74].mxu1  ;;  %3721 = vmatmul.mubr.msk.f32.gmra.mrb[70].mxu0 %vm889_vm2, %v2063_v18 }
 0x2eb   : > { %v1841_v21 = vadd.f32 %v3640_v20, %v4477_v41  ;;  %v1835_v22 = vpop.f32.mrb[75].mxu1  ;;  %v2065_v27 = vsel %vm1969_vm4, %v1831_v13, %v2017_v17 }
 0x2ec   : > { %v1836_v24 = vadd.f32 %v4477_v41, %v1835_v22  ;;  %v2064_v25 = vsel %vm1968_vm5, %v1826_v15, %v2016_v19 }
 0x2ed   : > { %v2019_v26 = vmul.f32 0.01, %v1841_v21  ;;  %3723 = vmatprep.mubr.msk.f32.mxu0 %vm889_vm2, %v2064_v25  ;;  %vm1971_vm7 = vcmp.ge.f32.partialorder %v1841_v21, 0.0 }
 0x2ee   : > { %vm1970_vm8 = vcmp.ge.f32.partialorder %v1836_v24, 0.0  ;;  %v2018_v28 = vmul.f32 0.01, %v1836_v24  ;;  %v3643_v29 = vpop.f32.mrb[76].mxu1  ;;  %3724 = vmatmul.mubr.msk.f32.gmra.mrb[72].mxu0 %vm889_vm2, %v2065_v27 }
 0x2ef   : > { %v1851_v23 = vadd.f32 %v3643_v29, %v4477_v41  ;;  %v1845_v30 = vpop.f32.mrb[77].mxu1  ;;  %v2067_v34 = vsel %vm1971_vm7, %v1841_v21, %v2019_v26 }
 0x2f0   : > { %v1846_v31 = vadd.f32 %v4477_v41, %v1845_v30  ;;  %v2066_v32 = vsel %vm1970_vm8, %v1836_v24, %v2018_v28 }
 0x2f1   : > { %v2021_v33 = vmul.f32 0.01, %v1851_v23  ;;  %3726 = vmatprep.mubr.msk.f32.mxu0 %vm889_vm2, %v2066_v32  ;;  %vm1973_vm9 = vcmp.ge.f32.partialorder %v1851_v23, 0.0 }
 0x2f2   : > { %vm1972_vm10 = vcmp.ge.f32.partialorder %v1846_v31, 0.0  ;;  %v2020_v35 = vmul.f32 0.01, %v1846_v31  ;;  %v3646_v36 = vpop.f32.mrb[78].mxu1  ;;  %3727 = vmatmul.mubr.msk.f32.gmra.mrb[74].mxu0 %vm889_vm2, %v2067_v34 }
 0x2f3   : > { %v1861_v37 = vadd.f32 %v3646_v36, %v4477_v41  ;;  %v1855_v38 = vpop.f32.mrb[79].mxu1  ;;  %v2069_v43 = vsel %vm1973_vm9, %v1851_v23, %v2021_v33 }
 0x2f4   : > { %v1856_v39 = vadd.f32 %v4477_v41, %v1855_v38  ;;  %v2068_v40 = vsel %vm1972_vm10, %v1846_v31, %v2020_v35 }
 0x2f5   : > { %v2023_v42 = vmul.f32 0.01, %v1861_v37  ;;  %3729 = vmatprep.mubr.msk.f32.mxu0 %vm889_vm2, %v2068_v40  ;;  %vm1975_vm11 = vcmp.ge.f32.partialorder %v1861_v37, 0.0 }
 0x2f6   : > { %vm1974_vm12 = vcmp.ge.f32.partialorder %v1856_v39, 0.0  ;;  %v2022_v44 = vmul.f32 0.01, %v1856_v39  ;;  %v3649_v45 = vpop.f32.mrb[80].mxu1  ;;  %3730 = vmatmul.mubr.msk.f32.gmra.mrb[76].mxu0 %vm889_vm2, %v2069_v43 }
 0x2f7   : > { %v1871_v46 = vadd.f32 %v3649_v45, %v4477_v41  ;;  %v1865_v47 = vpop.f32.mrb[81].mxu1  ;;  %v2071_v51 = vsel %vm1975_vm11, %v1861_v37, %v2023_v42 }
 0x2f8   : > { %v1866_v48 = vadd.f32 %v4477_v41, %v1865_v47  ;;  %v2070_v49 = vsel %vm1974_vm12, %v1856_v39, %v2022_v44 }
 0x2f9   : > { %v2025_v50 = vmul.f32 0.01, %v1871_v46  ;;  %3732 = vmatprep.mubr.msk.f32.mxu0 %vm889_vm2, %v2070_v49  ;;  %vm1977_vm6 = vcmp.ge.f32.partialorder %v1871_v46, 0.0 }
 0x2fa   : > { %vm1976_vm13 = vcmp.ge.f32.partialorder %v1866_v48, 0.0  ;;  %v2024_v52 = vmul.f32 0.01, %v1866_v48  ;;  %v3652_v53 = vpop.f32.mrb[82].mxu1  ;;  %3733 = vmatmul.mubr.msk.f32.gmra.mrb[78].mxu0 %vm889_vm2, %v2071_v51 }
 0x2fb   : > { %v1881_v54 = vadd.f32 %v3652_v53, %v4477_v41  ;;  %v1875_v55 = vpop.f32.mrb[83].mxu1  ;;  %v2073_v59 = vsel %vm1977_vm6, %v1871_v46, %v2025_v50 }
 0x2fc   : > { %v1876_v56 = vadd.f32 %v4477_v41, %v1875_v55  ;;  %v2072_v57 = vsel %vm1976_vm13, %v1866_v48, %v2024_v52 }
 0x2fd   : > { %v2027_v58 = vmul.f32 0.01, %v1881_v54  ;;  %3735 = vmatprep.mubr.msk.f32.mxu0 %vm889_vm2, %v2072_v57  ;;  %vm1979_vm14 = vcmp.ge.f32.partialorder %v1881_v54, 0.0 }
 0x2fe   : > { %vm1978_vm15 = vcmp.ge.f32.partialorder %v1876_v56, 0.0  ;;  %v2026_v60 = vmul.f32 0.01, %v1876_v56  ;;  %v3655_v61 = vpop.f32.mrb[84].mxu1  ;;  %3736 = vmatmul.mubr.msk.f32.gmra.mrb[80].mxu0 %vm889_vm2, %v2073_v59 }
 0x2ff   : > { %v1891_v62 = vadd.f32 %v3655_v61, %v4477_v41  ;;  %v1885_v63 = vpop.f32.mrb[85].mxu1  ;;  %v2075_v3 = vsel %vm1979_vm14, %v1881_v54, %v2027_v58 }
 0x300   : > { %v1886_v0 = vadd.f32 %v4477_v41, %v1885_v63  ;;  %v2074_v1 = vsel %vm1978_vm15, %v1876_v56, %v2026_v60 }
 0x301   : > { %v2029_v2 = vmul.f32 0.01, %v1891_v62  ;;  %3738 = vmatprep.mubr.msk.f32.mxu0 %vm889_vm2, %v2074_v1  ;;  %vm1981_vm0 = vcmp.ge.f32.partialorder %v1891_v62, 0.0 }
 0x302   : > { %vm1980_vm1 = vcmp.ge.f32.partialorder %v1886_v0, 0.0  ;;  %v2028_v4 = vmul.f32 0.01, %v1886_v0  ;;  %v3658_v5 = vpop.f32.mrb[86].mxu1  ;;  %3739 = vmatmul.mubr.msk.f32.gmra.mrb[82].mxu0 %vm889_vm2, %v2075_v3 }
 0x303   : > { %v1901_v6 = vadd.f32 %v3658_v5, %v4477_v41  ;;  %v1895_v7 = vpop.f32.mrb[87].mxu1  ;;  %v2077_v11 = vsel %vm1981_vm0, %v1891_v62, %v2029_v2 }
 0x304   : > { %v1896_v8 = vadd.f32 %v4477_v41, %v1895_v7  ;;  %v2076_v9 = vsel %vm1980_vm1, %v1886_v0, %v2028_v4 }
 0x305   : > { %v2031_v10 = vmul.f32 0.01, %v1901_v6  ;;  %3741 = vmatprep.mubr.msk.f32.mxu0 %vm889_vm2, %v2076_v9  ;;  %vm1983_vm3 = vcmp.ge.f32.partialorder %v1901_v6, 0.0 }
 0x306   : > { %vm1982_vm4 = vcmp.ge.f32.partialorder %v1896_v8, 0.0  ;;  %v2030_v12 = vmul.f32 0.01, %v1896_v8  ;;  %v3661_v13 = vpop.f32.mrb[88].mxu1  ;;  %3742 = vmatmul.mubr.msk.f32.gmra.mrb[84].mxu0 %vm889_vm2, %v2077_v11 }
 0x307   : > { %v1911_v14 = vadd.f32 %v3661_v13, %v4477_v41  ;;  %v1905_v15 = vpop.f32.mrb[89].mxu1  ;;  %v2079_v19 = vsel %vm1983_vm3, %v1901_v6, %v2031_v10 }
 0x308   : > { %v1906_v16 = vadd.f32 %v4477_v41, %v1905_v15  ;;  %v2078_v17 = vsel %vm1982_vm4, %v1896_v8, %v2030_v12 }
 0x309   : > { %v2033_v18 = vmul.f32 0.01, %v1911_v14  ;;  %3744 = vmatprep.mubr.msk.f32.mxu0 %vm889_vm2, %v2078_v17  ;;  %vm1985_vm5 = vcmp.ge.f32.partialorder %v1911_v14, 0.0 }
 0x30a   : > { %vm1984_vm7 = vcmp.ge.f32.partialorder %v1906_v16, 0.0  ;;  %v2032_v20 = vmul.f32 0.01, %v1906_v16  ;;  %v3664_v21 = vpop.f32.mrb[90].mxu1  ;;  %3745 = vmatmul.mubr.msk.f32.gmra.mrb[86].mxu0 %vm889_vm2, %v2079_v19 }
 0x30b   : > { %v1921_v22 = vadd.f32 %v3664_v21, %v4477_v41  ;;  %v1915_v24 = vpop.f32.mrb[91].mxu1  ;;  %v2081_v28 = vsel %vm1985_vm5, %v1911_v14, %v2033_v18 }
 0x30c   : > { %v1916_v25 = vadd.f32 %v4477_v41, %v1915_v24  ;;  %v2080_v26 = vsel %vm1984_vm7, %v1906_v16, %v2032_v20 }
 0x30d   : > { %v2035_v27 = vmul.f32 0.01, %v1921_v22  ;;  %3747 = vmatprep.mubr.msk.f32.mxu0 %vm889_vm2, %v2080_v26  ;;  %vm1987_vm8 = vcmp.ge.f32.partialorder %v1921_v22, 0.0 }
 0x30e   : > { %vm1986_vm9 = vcmp.ge.f32.partialorder %v1916_v25, 0.0  ;;  %v2034_v29 = vmul.f32 0.01, %v1916_v25  ;;  %v3667_v23 = vpop.f32.mrb[92].mxu1  ;;  %3748 = vmatmul.mubr.msk.f32.gmra.mrb[88].mxu0 %vm889_vm2, %v2081_v28 }
 0x30f   : > { %v1931_v30 = vadd.f32 %v3667_v23, %v4477_v41  ;;  %v1925_v31 = vpop.f32.mrb[93].mxu1  ;;  %v2083_v35 = vsel %vm1987_vm8, %v1921_v22, %v2035_v27 }
 0x310   : > { %v1926_v32 = vadd.f32 %v4477_v41, %v1925_v31  ;;  %v2082_v33 = vsel %vm1986_vm9, %v1916_v25, %v2034_v29 }
 0x311   : > { %v2037_v34 = vmul.f32 0.01, %v1931_v30  ;;  %3750 = vmatprep.mubr.msk.f32.mxu0 %vm889_vm2, %v2082_v33  ;;  %vm1989_vm10 = vcmp.ge.f32.partialorder %v1931_v30, 0.0 }
 0x312   : > { %vm1988_vm11 = vcmp.ge.f32.partialorder %v1926_v32, 0.0  ;;  %v2036_v36 = vmul.f32 0.01, %v1926_v32  ;;  %v3670_v37 = vpop.f32.mrb[94].mxu1  ;;  %3751 = vmatmul.mubr.msk.f32.gmra.mrb[90].mxu0 %vm889_vm2, %v2083_v35 }
 0x313   : > { %v1941_v38 = vadd.f32 %v3670_v37, %v4477_v41  ;;  %v1935_v39 = vpop.f32.mrb[95].mxu1  ;;  %v2085_v43 = vsel %vm1989_vm10, %v1931_v30, %v2037_v34 }
 0x314   : > { %v1936_v40 = vadd.f32 %v4477_v41, %v1935_v39  ;;  %v2084_v42 = vsel %vm1988_vm11, %v1926_v32, %v2036_v36  ;;  %v4579_v41 = vld [vmem:[%s4856_s8] ss:$0 sm:$0xff] }
 0x315   : > { %v2039_v44 = vmul.f32 0.01, %v1941_v38  ;;  %3753 = vmatprep.mubr.msk.f32.mxu1 %vm889_vm2, %v2084_v42  ;;  %vm1991_vm12 = vcmp.ge.f32.partialorder %v1941_v38, 0.0 }
 0x316   : > { %vm1990_vm6 = vcmp.ge.f32.partialorder %v1936_v40, 0.0  ;;  %v2038_v45 = vmul.f32 0.01, %v1936_v40  ;;  %3754 = vmatmul.mubr.msk.f32.vlgmr.msra.gmra.mrb[96].mxu1 %vm889_vm2, %v2085_v43 }
 0x317   : > { %v2087_v47 = vsel %vm1991_vm12, %v1941_v38, %v2039_v44 }
 0x318   : > { %v2086_v46 = vsel %vm1990_vm6, %v1936_v40, %v2038_v45 }
 0x319   : > { %3756 = vmatprep.mubr.msk.f32.mxu1 %vm889_vm2, %v2086_v46 }
 0x31a   : > { %3757 = vmatmul.mubr.msk.f32.gmra.mrb[98].mxu1 %vm889_vm2, %v2087_v47 }
 0x391   : > { %v3689_v48 = vpop.f32.mrb[48].mxu0 }
 0x392   : > { %v2319_v49 = vadd.f32 %v3689_v48, %v4579_v41  ;;  %v2313_v50 = vpop.f32.mrb[49].mxu0 }
 0x393   : > { %v2314_v51 = vadd.f32 %v4579_v41, %v2313_v50 }
 0x394   : > { %2553 = vst [vmem:[%s4583_s19 + $0x8] sm:$0xff] %v2319_v49 }
 0x395   : > { %2552 = vst [vmem:[%s4583_s19] sm:$0xff] %v2314_v51  ;;  %v3692_v52 = vpop.f32.mrb[50].mxu0 }
 0x396   : > { %v2329_v53 = vadd.f32 %v3692_v52, %v4579_v41  ;;  %v2323_v54 = vpop.f32.mrb[51].mxu0 }
 0x397   : > { %v2324_v55 = vadd.f32 %v4579_v41, %v2323_v54 }
 0x398   : > { %2555 = vst [vmem:[%s4583_s19 + $0x18] sm:$0xff] %v2329_v53 }
 0x399   : > { %2554 = vst [vmem:[%s4583_s19 + $0x10] sm:$0xff] %v2324_v55  ;;  %v3695_v56 = vpop.f32.mrb[52].mxu0 }
 0x39a   : > { %v2339_v57 = vadd.f32 %v3695_v56, %v4579_v41  ;;  %v2333_v58 = vpop.f32.mrb[53].mxu0 }
 0x39b   : > { %v2334_v59 = vadd.f32 %v4579_v41, %v2333_v58 }
 0x39c   : > { %2557 = vst [vmem:[%s4583_s19 + $0x28] sm:$0xff] %v2339_v57 }
 0x39d   : > { %2556 = vst [vmem:[%s4583_s19 + $0x20] sm:$0xff] %v2334_v59  ;;  %v3698_v60 = vpop.f32.mrb[54].mxu0 }
 0x39e   : > { %v2349_v61 = vadd.f32 %v3698_v60, %v4579_v41  ;;  %v2343_v62 = vpop.f32.mrb[55].mxu0 }
 0x39f   : > { %v2344_v63 = vadd.f32 %v4579_v41, %v2343_v62 }
 0x3a0   : > { %2559 = vst [vmem:[%s4583_s19 + $0x38] sm:$0xff] %v2349_v61 }
 0x3a1   : > { %2558 = vst [vmem:[%s4583_s19 + $0x30] sm:$0xff] %v2344_v63  ;;  %v3701_v0 = vpop.f32.mrb[56].mxu0 }
 0x3a2   : > { %v2359_v1 = vadd.f32 %v3701_v0, %v4579_v41  ;;  %v2353_v2 = vpop.f32.mrb[57].mxu0 }
 0x3a3   : > { %v2354_v3 = vadd.f32 %v4579_v41, %v2353_v2 }
 0x3a4   : > { %2561 = vst [vmem:[%s4583_s19 + $0x48] sm:$0xff] %v2359_v1 }
 0x3a5   : > { %2560 = vst [vmem:[%s4583_s19 + $0x40] sm:$0xff] %v2354_v3  ;;  %v3704_v4 = vpop.f32.mrb[58].mxu0 }
 0x3a6   : > { %v2369_v5 = vadd.f32 %v3704_v4, %v4579_v41  ;;  %v2363_v6 = vpop.f32.mrb[59].mxu0 }
 0x3a7   : > { %v2364_v7 = vadd.f32 %v4579_v41, %v2363_v6 }
 0x3a8   : > { %2563 = vst [vmem:[%s4583_s19 + $0x58] sm:$0xff] %v2369_v5 }
 0x3a9   : > { %2562 = vst [vmem:[%s4583_s19 + $0x50] sm:$0xff] %v2364_v7  ;;  %v3707_v8 = vpop.f32.mrb[60].mxu0 }
 0x3aa   : > { %v2379_v9 = vadd.f32 %v3707_v8, %v4579_v41  ;;  %v2373_v10 = vpop.f32.mrb[61].mxu0 }
 0x3ab   : > { %v2374_v11 = vadd.f32 %v4579_v41, %v2373_v10 }
 0x3ac   : > { %2565 = vst [vmem:[%s4583_s19 + $0x68] sm:$0xff] %v2379_v9 }
 0x3ad   : > { %2564 = vst [vmem:[%s4583_s19 + $0x60] sm:$0xff] %v2374_v11  ;;  %v3710_v12 = vpop.f32.mrb[62].mxu0 }
 0x3ae   : > { %v2389_v13 = vadd.f32 %v3710_v12, %v4579_v41  ;;  %v2383_v14 = vpop.f32.mrb[63].mxu0 }
 0x3af   : > { %v2384_v15 = vadd.f32 %v4579_v41, %v2383_v14 }
 0x3b0   : > { %2567 = vst [vmem:[%s4583_s19 + $0x78] sm:$0xff] %v2389_v13 }
 0x3b1   : > { %2566 = vst [vmem:[%s4583_s19 + $0x70] sm:$0xff] %v2384_v15  ;;  %v3713_v16 = vpop.f32.mrb[64].mxu0 }
 0x3b2   : > { %v2399_v17 = vadd.f32 %v3713_v16, %v4579_v41  ;;  %v2393_v18 = vpop.f32.mrb[65].mxu0 }
 0x3b3   : > { %v2394_v19 = vadd.f32 %v4579_v41, %v2393_v18 }
 0x3b4   : > { %2569 = vst [vmem:[%s4583_s19 + $0x88] sm:$0xff] %v2399_v17 }
 0x3b5   : > { %2568 = vst [vmem:[%s4583_s19 + $0x80] sm:$0xff] %v2394_v19  ;;  %v3716_v20 = vpop.f32.mrb[66].mxu0 }
 0x3b6   : > { %v2409_v21 = vadd.f32 %v3716_v20, %v4579_v41  ;;  %v2403_v22 = vpop.f32.mrb[67].mxu0 }
 0x3b7   : > { %v2404_v24 = vadd.f32 %v4579_v41, %v2403_v22 }
 0x3b8   : > { %2571 = vst [vmem:[%s4583_s19 + $0x98] sm:$0xff] %v2409_v21 }
 0x3b9   : > { %2570 = vst [vmem:[%s4583_s19 + $0x90] sm:$0xff] %v2404_v24  ;;  %v3719_v25 = vpop.f32.mrb[68].mxu0 }
 0x3ba   : > { %v2419_v26 = vadd.f32 %v3719_v25, %v4579_v41  ;;  %v2413_v27 = vpop.f32.mrb[69].mxu0 }
 0x3bb   : > { %v2414_v28 = vadd.f32 %v4579_v41, %v2413_v27 }
 0x3bc   : > { %2573 = vst [vmem:[%s4583_s19 + $0xa8] sm:$0xff] %v2419_v26 }
 0x3bd   : > { %2572 = vst [vmem:[%s4583_s19 + $0xa0] sm:$0xff] %v2414_v28  ;;  %v3722_v29 = vpop.f32.mrb[70].mxu0 }
 0x3be   : > { %v2429_v23 = vadd.f32 %v3722_v29, %v4579_v41  ;;  %v2423_v30 = vpop.f32.mrb[71].mxu0 }
 0x3bf   : > { %v2424_v31 = vadd.f32 %v4579_v41, %v2423_v30 }
 0x3c0   : > { %2575 = vst [vmem:[%s4583_s19 + $0xb8] sm:$0xff] %v2429_v23 }
 0x3c1   : > { %2574 = vst [vmem:[%s4583_s19 + $0xb0] sm:$0xff] %v2424_v31  ;;  %v3725_v32 = vpop.f32.mrb[72].mxu0 }
 0x3c2   : > { %v2439_v33 = vadd.f32 %v3725_v32, %v4579_v41  ;;  %v2433_v34 = vpop.f32.mrb[73].mxu0 }
 0x3c3   : > { %v2434_v35 = vadd.f32 %v4579_v41, %v2433_v34 }
 0x3c4   : > { %2577 = vst [vmem:[%s4583_s19 + $0xc8] sm:$0xff] %v2439_v33 }
 0x3c5   : > { %2576 = vst [vmem:[%s4583_s19 + $0xc0] sm:$0xff] %v2434_v35  ;;  %v3728_v36 = vpop.f32.mrb[74].mxu0 }
 0x3c6   : > { %v2449_v37 = vadd.f32 %v3728_v36, %v4579_v41  ;;  %v2443_v38 = vpop.f32.mrb[75].mxu0 }
 0x3c7   : > { %v2444_v39 = vadd.f32 %v4579_v41, %v2443_v38 }
 0x3c8   : > { %2579 = vst [vmem:[%s4583_s19 + $0xd8] sm:$0xff] %v2449_v37 }
 0x3c9   : > { %2578 = vst [vmem:[%s4583_s19 + $0xd0] sm:$0xff] %v2444_v39  ;;  %v3731_v40 = vpop.f32.mrb[76].mxu0 }
 0x3ca   : > { %v2459_v42 = vadd.f32 %v3731_v40, %v4579_v41  ;;  %v2453_v43 = vpop.f32.mrb[77].mxu0 }
 0x3cb   : > { %v2454_v44 = vadd.f32 %v4579_v41, %v2453_v43 }
 0x3cc   : > { %2581 = vst [vmem:[%s4583_s19 + $0xe8] sm:$0xff] %v2459_v42 }
 0x3cd   : > { %2580 = vst [vmem:[%s4583_s19 + $0xe0] sm:$0xff] %v2454_v44  ;;  %v3734_v45 = vpop.f32.mrb[78].mxu0 }
 0x3ce   : > { %v2469_v46 = vadd.f32 %v3734_v45, %v4579_v41  ;;  %v2463_v47 = vpop.f32.mrb[79].mxu0 }
 0x3cf   : > { %v2464_v48 = vadd.f32 %v4579_v41, %v2463_v47 }
 0x3d0   : > { %2583 = vst [vmem:[%s4583_s19 + $0xf8] sm:$0xff] %v2469_v46 }
 0x3d1   : > { %2582 = vst [vmem:[%s4583_s19 + $0xf0] sm:$0xff] %v2464_v48  ;;  %v3737_v49 = vpop.f32.mrb[80].mxu0 }
 0x3d2   : > { %v2479_v50 = vadd.f32 %v3737_v49, %v4579_v41  ;;  %v2473_v51 = vpop.f32.mrb[81].mxu0 }
 0x3d3   : > { %v2474_v52 = vadd.f32 %v4579_v41, %v2473_v51 }
 0x3d4   : > { %2585 = vst [vmem:[%s4583_s19 + $0x108] sm:$0xff] %v2479_v50 }
 0x3d5   : > { %2584 = vst [vmem:[%s4583_s19 + $0x100] sm:$0xff] %v2474_v52  ;;  %v3740_v53 = vpop.f32.mrb[82].mxu0 }
 0x3d6   : > { %v2489_v54 = vadd.f32 %v3740_v53, %v4579_v41  ;;  %v2483_v55 = vpop.f32.mrb[83].mxu0 }
 0x3d7   : > { %v2484_v56 = vadd.f32 %v4579_v41, %v2483_v55 }
 0x3d8   : > { %2587 = vst [vmem:[%s4583_s19 + $0x118] sm:$0xff] %v2489_v54 }
 0x3d9   : > { %2586 = vst [vmem:[%s4583_s19 + $0x110] sm:$0xff] %v2484_v56  ;;  %v3743_v57 = vpop.f32.mrb[84].mxu0 }
 0x3da   : > { %v2499_v58 = vadd.f32 %v3743_v57, %v4579_v41  ;;  %v2493_v59 = vpop.f32.mrb[85].mxu0 }
 0x3db   : > { %v2494_v60 = vadd.f32 %v4579_v41, %v2493_v59 }
 0x3dc   : > { %2589 = vst [vmem:[%s4583_s19 + $0x128] sm:$0xff] %v2499_v58 }
 0x3dd   : > { %2588 = vst [vmem:[%s4583_s19 + $0x120] sm:$0xff] %v2494_v60  ;;  %v3746_v61 = vpop.f32.mrb[86].mxu0 }
 0x3de   : > { %v2509_v62 = vadd.f32 %v3746_v61, %v4579_v41  ;;  %v2503_v63 = vpop.f32.mrb[87].mxu0 }
 0x3df   : > { %v2504_v0 = vadd.f32 %v4579_v41, %v2503_v63 }
 0x3e0   : > { %2591 = vst [vmem:[%s4583_s19 + $0x138] sm:$0xff] %v2509_v62 }
 0x3e1   : > { %2590 = vst [vmem:[%s4583_s19 + $0x130] sm:$0xff] %v2504_v0  ;;  %v3749_v1 = vpop.f32.mrb[88].mxu0 }
 0x3e2   : > { %v2519_v2 = vadd.f32 %v3749_v1, %v4579_v41  ;;  %v2513_v3 = vpop.f32.mrb[89].mxu0 }
 0x3e3   : > { %v2514_v4 = vadd.f32 %v4579_v41, %v2513_v3 }
 0x3e4   : > { %2593 = vst [vmem:[%s4583_s19 + $0x148] sm:$0xff] %v2519_v2 }
 0x3e5   : > { %2592 = vst [vmem:[%s4583_s19 + $0x140] sm:$0xff] %v2514_v4  ;;  %v3752_v5 = vpop.f32.mrb[90].mxu0 }
 0x3e6   : > { %v2529_v6 = vadd.f32 %v3752_v5, %v4579_v41  ;;  %v2523_v7 = vpop.f32.mrb[91].mxu0 }
 0x3e7   : > { %v2524_v8 = vadd.f32 %v4579_v41, %v2523_v7 }
 0x3e8   : > { %2595 = vst [vmem:[%s4583_s19 + $0x158] sm:$0xff] %v2529_v6 }
 0x3e9   : > { %2594 = vst [vmem:[%s4583_s19 + $0x150] sm:$0xff] %v2524_v8  ;;  %v3755_v9 = vpop.f32.mrb[96].mxu1 }
 0x3ea   : > { %v2539_v10 = vadd.f32 %v3755_v9, %v4579_v41  ;;  %v2533_v11 = vpop.f32.mrb[97].mxu1 }
 0x3eb   : > { %v2534_v12 = vadd.f32 %v4579_v41, %v2533_v11  ;;  %2606 = sbr.rel (!%p4096_p4) target bundleno = 1086 (0x43e), region = 60 }
 0x3ec   : > { %2597 = vst [vmem:[%s4583_s19 + $0x168] sm:$0xff] %v2539_v10 }
 0x3ed   : > { %2596 = vst [vmem:[%s4583_s19 + $0x160] sm:$0xff] %v2534_v12  ;;  %v3758_v13 = vpop.f32.mrb[98].mxu1 }
 0x3ee   : > { %v2549_v14 = vadd.f32 %v3758_v13, %v4579_v41  ;;  %v2543_v15 = vpop.f32.mrb[99].mxu1 }
 0x3ef   : > { %v2544_v16 = vadd.f32 %v4579_v41, %v2543_v15 }
 0x3f0   : > { %2599 = vst [vmem:[%s4583_s19 + $0x178] sm:$0xff] %v2549_v14 }
 0x3f1   : > { %2598 = vst [vmem:[%s4583_s19 + $0x170] sm:$0xff] %v2544_v16 }
 0x3f2   : > { %s4868_s30 = smov (!%p2609_p8, %s2608_s30), 48 }
 0x3f3   : > { %s3158_s28 = sshll.u32 %s4868_s30, 7 }
 0x3f4   : > { %p3161_p9 = scmp.eq.s32.totalorder %s3158_s28, 0 }
 0x3f5   : > { %3929 = sdivrem.u32 (!%p3161_p9), %s4868_s30, 48 }
 0x3f6   : > { %2617 = sbr.rel (%p3161_p9) target bundleno = 1086 (0x43e), region = 64 }
 0x3fe   : > { %s4692_s17 = spop.drf %3929 }
 0x3ff   : > { %p3162_p10 = scmp.le.s32.totalorder %s4692_s17, 0 }
 0x400   : > { %s4859_s12 = smov (!%p3162_p10), %s4686_s27  ;;  %s4860_s24 = smov (!%p3162_p10), %s4583_s19 }
 0x401   : > { %2961 = sbr.rel (%p3162_p10) target bundleno = 1057 (0x421), region = 140  ;;  %s4701_s29 = smov (!%p3162_p10), 0  }
 0x402   : > { %s4703_s11 = smov (!%p3162_p10), 0  }
 0x408 LB: >> { %v2775_v41 = vld [vmem:[%s3995_s24] sm:$0xff]  ;;  %v2777_v17 = vld [vmem:[%s3995_s24 + $0x8] sm:$0xff]  ;;  %v2779_v18 = vld [vmem:[%s3995_s24 + $0x10] sm:$0xff]  ;;  %s2871_s15 = sadd.s32 1, %s3999_s29  ;;  %s2769_s11 = sadd.s32 1, %s4003_s11   ;;  %s4003_s11 = sphi %s4703_s11, %s2769_s11   ;;  %s3999_s29 = sphi %s4701_s29, %s4863_s29   ;;  %s3995_s24 = sphi %s4860_s24, %s4862_s24   ;;  %s3991_s12 = sphi %s4859_s12, %s4861_s12  }
 0x409   : >> { %2776 = vst [vmem:[%s3991_s12] sm:$0xff] %v2775_v41  ;;  %2778 = vst [vmem:[%s3991_s12 + $0x8] sm:$0xff] %v2777_v17  ;;  %v2781_v19 = vld [vmem:[%s3995_s24 + $0x18] sm:$0xff]  ;;  %v2783_v20 = vld [vmem:[%s3995_s24 + $0x20] sm:$0xff]  ;;  %p2872_p11 = scmp.ge.s32.totalorder %s2871_s15, %s4692_s17  ;;  %p2768_p12 = scmp.ge.s32.totalorder %s2769_s11, %s4692_s17 }
 0x40a   : >> { %2780 = vst [vmem:[%s3991_s12 + $0x10] sm:$0xff] %v2779_v18  ;;  %v2785_v21 = vld [vmem:[%s3995_s24 + $0x28] sm:$0xff]  ;;  %2782 = vst [vmem:[%s3991_s12 + $0x18] sm:$0xff] %v2781_v19  ;;  %v2787_v22 = vld [vmem:[%s3995_s24 + $0x30] sm:$0xff] }
 0x40b   : >> { %2784 = vst [vmem:[%s3991_s12 + $0x20] sm:$0xff] %v2783_v20  ;;  %2786 = vst [vmem:[%s3991_s12 + $0x28] sm:$0xff] %v2785_v21  ;;  %v2789_v24 = vld [vmem:[%s3995_s24 + $0x38] sm:$0xff]  ;;  %v2791_v25 = vld [vmem:[%s3995_s24 + $0x40] sm:$0xff]  ;;  %s4870_s15 = smov (%p2872_p11, %s2871_s15), 0 }
 0x40c   : >> { %2788 = vst [vmem:[%s3991_s12 + $0x30] sm:$0xff] %v2787_v22  ;;  %2790 = vst [vmem:[%s3991_s12 + $0x38] sm:$0xff] %v2789_v24  ;;  %v2793_v26 = vld [vmem:[%s3995_s24 + $0x48] sm:$0xff]  ;;  %v2795_v27 = vld [vmem:[%s3995_s24 + $0x50] sm:$0xff]  ;;  %s2874_s18 = smul.u32 384, %s4870_s15  ;;  %s4863_s29 = smov %s4870_s15 }
 0x40d   : >> { %2792 = vst [vmem:[%s3991_s12 + $0x40] sm:$0xff] %v2791_v25  ;;  %v2797_v28 = vld [vmem:[%s3995_s24 + $0x58] sm:$0xff]  ;;  %2794 = vst [vmem:[%s3991_s12 + $0x48] sm:$0xff] %v2793_v26  ;;  %v2799_v29 = vld [vmem:[%s3995_s24 + $0x60] sm:$0xff] }
 0x40e   : >> { %2796 = vst [vmem:[%s3991_s12 + $0x50] sm:$0xff] %v2795_v27  ;;  %2798 = vst [vmem:[%s3991_s12 + $0x58] sm:$0xff] %v2797_v28  ;;  %v2801_v23 = vld [vmem:[%s3995_s24 + $0x68] sm:$0xff]  ;;  %v2803_v30 = vld [vmem:[%s3995_s24 + $0x70] sm:$0xff]  ;;  %s4765_s14 = scalar_lea.vmem %s4583_s19, %s2874_s18 [#allocation2]   ;;  %s4768_s20 = scalar_lea.vmem %s4686_s27, %s2874_s18  }
 0x40f   : >> { %2800 = vst [vmem:[%s3991_s12 + $0x60] sm:$0xff] %v2799_v29  ;;  %2802 = vst [vmem:[%s3991_s12 + $0x68] sm:$0xff] %v2801_v23  ;;  %v2805_v31 = vld [vmem:[%s3995_s24 + $0x78] sm:$0xff]  ;;  %v2807_v32 = vld [vmem:[%s3995_s24 + $0x80] sm:$0xff] }
 0x410   : >> { %2804 = vst [vmem:[%s3991_s12 + $0x70] sm:$0xff] %v2803_v30  ;;  %v2809_v33 = vld [vmem:[%s3995_s24 + $0x88] sm:$0xff]  ;;  %2806 = vst [vmem:[%s3991_s12 + $0x78] sm:$0xff] %v2805_v31  ;;  %v2811_v34 = vld [vmem:[%s3995_s24 + $0x90] sm:$0xff] }
 0x411   : >> { %2808 = vst [vmem:[%s3991_s12 + $0x80] sm:$0xff] %v2807_v32  ;;  %2810 = vst [vmem:[%s3991_s12 + $0x88] sm:$0xff] %v2809_v33  ;;  %v2813_v35 = vld [vmem:[%s3995_s24 + $0x98] sm:$0xff]  ;;  %v2815_v36 = vld [vmem:[%s3995_s24 + $0xa0] sm:$0xff] }
 0x412   : >> { %2812 = vst [vmem:[%s3991_s12 + $0x90] sm:$0xff] %v2811_v34  ;;  %2814 = vst [vmem:[%s3991_s12 + $0x98] sm:$0xff] %v2813_v35  ;;  %v2817_v37 = vld [vmem:[%s3995_s24 + $0xa8] sm:$0xff]  ;;  %v2819_v38 = vld [vmem:[%s3995_s24 + $0xb0] sm:$0xff] }
 0x413   : >> { %2816 = vst [vmem:[%s3991_s12 + $0xa0] sm:$0xff] %v2815_v36  ;;  %v2821_v39 = vld [vmem:[%s3995_s24 + $0xb8] sm:$0xff]  ;;  %2818 = vst [vmem:[%s3991_s12 + $0xa8] sm:$0xff] %v2817_v37  ;;  %v2823_v40 = vld [vmem:[%s3995_s24 + $0xc0] sm:$0xff] }
 0x414   : >> { %2820 = vst [vmem:[%s3991_s12 + $0xb0] sm:$0xff] %v2819_v38  ;;  %2822 = vst [vmem:[%s3991_s12 + $0xb8] sm:$0xff] %v2821_v39  ;;  %v2825_v42 = vld [vmem:[%s3995_s24 + $0xc8] sm:$0xff]  ;;  %v2827_v43 = vld [vmem:[%s3995_s24 + $0xd0] sm:$0xff] }
 0x415   : >> { %2824 = vst [vmem:[%s3991_s12 + $0xc0] sm:$0xff] %v2823_v40  ;;  %2826 = vst [vmem:[%s3991_s12 + $0xc8] sm:$0xff] %v2825_v42  ;;  %v2829_v44 = vld [vmem:[%s3995_s24 + $0xd8] sm:$0xff]  ;;  %v2831_v45 = vld [vmem:[%s3995_s24 + $0xe0] sm:$0xff] }
 0x416   : >> { %2828 = vst [vmem:[%s3991_s12 + $0xd0] sm:$0xff] %v2827_v43  ;;  %v2833_v46 = vld [vmem:[%s3995_s24 + $0xe8] sm:$0xff]  ;;  %2830 = vst [vmem:[%s3991_s12 + $0xd8] sm:$0xff] %v2829_v44  ;;  %v2835_v47 = vld [vmem:[%s3995_s24 + $0xf0] sm:$0xff] }
 0x417   : >> { %2832 = vst [vmem:[%s3991_s12 + $0xe0] sm:$0xff] %v2831_v45  ;;  %2834 = vst [vmem:[%s3991_s12 + $0xe8] sm:$0xff] %v2833_v46  ;;  %v2837_v48 = vld [vmem:[%s3995_s24 + $0xf8] sm:$0xff]  ;;  %v2839_v49 = vld [vmem:[%s3995_s24 + $0x100] sm:$0xff] }
 0x418   : >> { %2836 = vst [vmem:[%s3991_s12 + $0xf0] sm:$0xff] %v2835_v47  ;;  %2838 = vst [vmem:[%s3991_s12 + $0xf8] sm:$0xff] %v2837_v48  ;;  %v2841_v50 = vld [vmem:[%s3995_s24 + $0x108] sm:$0xff]  ;;  %v2843_v51 = vld [vmem:[%s3995_s24 + $0x110] sm:$0xff] }
 0x419   : >> { %2840 = vst [vmem:[%s3991_s12 + $0x100] sm:$0xff] %v2839_v49  ;;  %v2845_v52 = vld [vmem:[%s3995_s24 + $0x118] sm:$0xff]  ;;  %2842 = vst [vmem:[%s3991_s12 + $0x108] sm:$0xff] %v2841_v50  ;;  %v2847_v53 = vld [vmem:[%s3995_s24 + $0x120] sm:$0xff] }
 0x41a   : >> { %2844 = vst [vmem:[%s3991_s12 + $0x110] sm:$0xff] %v2843_v51  ;;  %2846 = vst [vmem:[%s3991_s12 + $0x118] sm:$0xff] %v2845_v52  ;;  %v2849_v54 = vld [vmem:[%s3995_s24 + $0x128] sm:$0xff]  ;;  %v2851_v55 = vld [vmem:[%s3995_s24 + $0x130] sm:$0xff]  ;;  %2771 = sbr.rel (!%p2768_p12) target bundleno = 1032 (0x408), region = 146 }
 0x41b   : >> { %2848 = vst [vmem:[%s3991_s12 + $0x120] sm:$0xff] %v2847_v53  ;;  %2850 = vst [vmem:[%s3991_s12 + $0x128] sm:$0xff] %v2849_v54  ;;  %v2853_v56 = vld [vmem:[%s3995_s24 + $0x138] sm:$0xff]  ;;  %v2855_v57 = vld [vmem:[%s3995_s24 + $0x140] sm:$0xff] }
 0x41c   : >> { %2852 = vst [vmem:[%s3991_s12 + $0x130] sm:$0xff] %v2851_v55  ;;  %v2857_v58 = vld [vmem:[%s3995_s24 + $0x148] sm:$0xff]  ;;  %2854 = vst [vmem:[%s3991_s12 + $0x138] sm:$0xff] %v2853_v56  ;;  %v2859_v59 = vld [vmem:[%s3995_s24 + $0x150] sm:$0xff] }
 0x41d   : >> { %2856 = vst [vmem:[%s3991_s12 + $0x140] sm:$0xff] %v2855_v57  ;;  %2858 = vst [vmem:[%s3991_s12 + $0x148] sm:$0xff] %v2857_v58  ;;  %v2861_v60 = vld [vmem:[%s3995_s24 + $0x158] sm:$0xff]  ;;  %v2863_v61 = vld [vmem:[%s3995_s24 + $0x160] sm:$0xff] }
 0x41e   : >> { %2860 = vst [vmem:[%s3991_s12 + $0x150] sm:$0xff] %v2859_v59  ;;  %2862 = vst [vmem:[%s3991_s12 + $0x158] sm:$0xff] %v2861_v60  ;;  %v2865_v62 = vld [vmem:[%s3995_s24 + $0x168] sm:$0xff]  ;;  %v2867_v63 = vld [vmem:[%s3995_s24 + $0x170] sm:$0xff] }
 0x41f   : >> { %2864 = vst [vmem:[%s3991_s12 + $0x160] sm:$0xff] %v2863_v61  ;;  %v2869_v0 = vld [vmem:[%s3995_s24 + $0x178] sm:$0xff]  ;;  %2866 = vst [vmem:[%s3991_s12 + $0x168] sm:$0xff] %v2865_v62  ;;  %s4862_s24 = smov %s4765_s14 }
 0x420   : >> { %2868 = vst [vmem:[%s3991_s12 + $0x170] sm:$0xff] %v2867_v63  ;;  %2870 = vst [vmem:[%s3991_s12 + $0x178] sm:$0xff] %v2869_v0  ;;  %s4861_s12 = smov %s4768_s20 }
 0x421 PF: > { %3931 = sdivrem.u32 %s4868_s30, 48 }
 0x422   : > { %s3163_s21 = smul.u32 384, %s4692_s17 }
 0x424   : > { %s2882_s22 = scalar_lea.vmem %s4583_s19, %s3163_s21 [#allocation2]   ;;  %s2884_s23 = scalar_lea.vmem %s4686_s27, %s3163_s21  }
 0x42a   : > { %s3932_s25 = spop.drf %3931 }
 0x42b   : > { %p3165_p13 = scmp.le.s32.totalorder %s3932_s25, 0 }
 0x42c   : > { %s4005_s26 = smov (!%p3165_p13), %s2884_s23   ;;  %s4009_s28 = smov (!%p3165_p13), %s2882_s22  }
 0x42d   : > { %2975 = sbr.rel (%p3165_p13) target bundleno = 1086 (0x43e), region = 151  ;;  %s4013_s18 = smov (!%p3165_p13), 0  }
 0x42e   : > { %s4017_s14 = smov (!%p3165_p13), 0  }
 0x434 LB: >> { %v2894_v1 = vld [vmem:[%s4011_s28] sm:$0xff]  ;;  %s2896_s12 = sadd.s32 1, %s4015_s18  ;;  %s2888_s14 = sadd.s32 1, %s4019_s14   ;;  %s4019_s14 = sphi %s4017_s14, %s2888_s14   ;;  %s4015_s18 = sphi %s4013_s18, %s4014_s18   ;;  %s4011_s28 = sphi %s4009_s28, %s2901_s28   ;;  %s4007_s26 = sphi %s4005_s26, %s2902_s26  }
 0x435   : >> { %2895 = vst [vmem:[%s4007_s26] sm:$0xff] %v2894_v1  ;;  %p2897_p0 = scmp.ge.s32.totalorder %s2896_s12, %s3932_s25  ;;  %p2887_p1 = scmp.ge.s32.totalorder %s2888_s14, %s3932_s25 }
 0x437   : >> { %s4872_s12 = smov (%p2897_p0, %s2896_s12), 0  ;;  %2890 = sbr.rel (!%p2887_p1) target bundleno = 1076 (0x434), region = 157 }
 0x438   : >> { %s3166_s19 = sshll.u32 %s4872_s12, 3  ;;  %s4014_s18 = smov %s4872_s12  }
 0x439   : >> { %s2901_s28 = scalar_lea.vmem %s2882_s22, %s3166_s19 [#allocation2]   ;;  %s2902_s26 = scalar_lea.vmem %s2884_s23, %s3166_s19  }
 0x43e PF: > { %p16_p2 = scmp.ge.s32.totalorder %s4086_s13, 4   ;;  %s4864_s30 = smov %s3983_s10 }
 0x43f   : > { %s4865_s10 = smov %s4094_s16  ;;  %s4866_s11 = smov %s4086_s13 }
 0x440   :  { %18 = sbr.rel (!%p16_p2) target bundleno = 2 (0x2), region = 168 }

</bundles_post_ra>
